<compile_context>
chip_gen: v5e
topology: v5e:2x2
jax: 0.10.0
libtpu: 0.0.40
codegen_flags: <defaults>
</compile_context>

<pallas_src>
import functools
import math

import jax
import jax.numpy as jnp
from jax import lax
from jax.experimental import pallas as pl
from jax.experimental.pallas import tpu as pltpu  # noqa: F401  (TPU backend)

# ----------------------------- config (small, synthetic) ---------------------
VOCAB = 100
EMB = 16            # ALBERT factorized embedding size
HID = 32            # hidden size
NHEADS = 2
HEAD_DIM = HID // NHEADS
INTER = 64          # intermediate (FFN) size
NLAYERS = 2         # ALBERT: layers share the same weights
MAXPOS = 64
NTYPES = 2
N_INTENT = 5
N_SLOT = 7
HEAD_PAD = 128      # lane-dense padded class dimension for head outputs
LN_EPS = 1e-12
B, S = 2, 8         # batch, seq

# --------------------- packed-slab static row offsets -------------------------
# epack: (E_ROWS, EMB) f32 — embedding tables + embedding LayerNorm params
E_WORD, E_POS, E_TYPE, E_LN_G, E_LN_B = 0, 104, 168, 176, 177
E_ROWS = 184
# hpack: (H_ROWS, 128) f32 — all hidden-space matrices (lane-padded) + 12 bias rows
H_EMB_MAP, H_QKV, H_ATTN_O, H_FFN_W, H_FFN_O, H_POOL, H_INTENT, H_SLOT = (
    0, 16, 48, 80, 112, 176, 208, 240)
H_BIAS = 272
H_ROWS = 288
(B_EMB_MAP, B_QKV, B_ATTN_O, B_ALN_G, B_ALN_B, B_FFN, B_FFN_O, B_FLN_G,
 B_FLN_B, B_POOL, B_INTENT, B_SLOT) = range(12)


# ----------------------------- fused encoder core ----------------------------
def _encoder_core(epack_ref, hpack_ref, tok_ref, mask_ref, *,
                  batch, seq, n_heads, head_dim, n_layers, eps, rowpad):
    hid = n_heads * head_dim
    n = batch * seq

    def w(row0, rows, cols):                 # static weight-slab slice (re-read per use)
        return hpack_ref[row0:row0 + rows, 0:cols]

    def bias(idx, cols):                     # single packed bias row
        r = H_BIAS + idx
        return hpack_ref[r:r + 1, 0:cols]

    def ln(x, g, bt):
        mean = jnp.mean(x, axis=-1, keepdims=True)
        var = jnp.mean((x - mean) ** 2, axis=-1, keepdims=True)
        return (x - mean) * lax.rsqrt(var + eps) * g + bt

    def gelu_new(y):                         # ALBERT gelu_new (tanh approximation)
        return 0.5 * y * (1.0 + jnp.tanh(0.7978845608028654 * (y + 0.044715 * y * y * y)))

    # ---- embeddings: in-kernel one-hot gathers on the MXU (word / position / type)
    ids = tok_ref[...]                       # (n, 2) int32: [:,0]=word id, [:,1]=type id
    word_id = ids[:, 0:1]
    type_id = ids[:, 1:2]

    wcol = lax.broadcasted_iota(jnp.int32, (n, VOCAB), 1)
    we = jnp.dot((wcol == word_id).astype(jnp.float32),
                 epack_ref[E_WORD:E_WORD + VOCAB, :],
                 preferred_element_type=jnp.float32)

    srow = lax.broadcasted_iota(jnp.int32, (batch, seq, MAXPOS), 1)
    pcol = lax.broadcasted_iota(jnp.int32, (batch, seq, MAXPOS), 2)
    p_oh = (pcol == srow).astype(jnp.float32).reshape(n, MAXPOS)
    pe = jnp.dot(p_oh, epack_ref[E_POS:E_POS + MAXPOS, :],
                 preferred_element_type=jnp.float32)

    tcol = lax.broadcasted_iota(jnp.int32, (n, NTYPES), 1)
    te = jnp.dot((tcol == type_id).astype(jnp.float32),
                 epack_ref[E_TYPE:E_TYPE + NTYPES, :],
                 preferred_element_type=jnp.float32)

    emb = ln(we + pe + te,
             epack_ref[E_LN_G:E_LN_G + 1, :], epack_ref[E_LN_B:E_LN_B + 1, :])

    # factorized embedding -> hidden projection (dropout == identity at eval)
    h = jnp.dot(emb, w(H_EMB_MAP, EMB, hid),
                preferred_element_type=jnp.float32) + bias(B_EMB_MAP, hid)

    add_mask = ((1.0 - mask_ref[...]) * -1e9)[:, None, :]          # (B, 1, S)

    def layer(_, h):
        # shared-layer weights re-read from VMEM each iteration (3 vld/cycle; avoids the
        # vreg-pressure of hoisting ~30 vregs across the unrolled loop).
        qkv = jnp.dot(h, w(H_QKV, hid, 3 * hid),
                      preferred_element_type=jnp.float32) + bias(B_QKV, 3 * hid)
        qkv3 = qkv.reshape(batch, seq, 3 * hid)

        # per-head attention; output projection folded per head
        # (concat(ctx) @ Wo == sum_h ctx_h @ Wo_h), so no lane concat is needed.
        # TODO(synk): a head-batched 4-D einsum (two batch dims) is the reviewer-preferred
        # form but risks an unsupported Mosaic relayout at these shapes; with n_heads=2 the
        # loop issues only a couple of extra XLU/MXU ops and the model is launch-bound.
        attn_out = bias(B_ATTN_O, hid)
        for hh in range(n_heads):
            q = qkv3[:, :, hh * head_dim:(hh + 1) * head_dim]       # scale folded into Wq
            k = qkv3[:, :, hid + hh * head_dim:hid + (hh + 1) * head_dim]
            v = qkv3[:, :, 2 * hid + hh * head_dim:2 * hid + (hh + 1) * head_dim]
            s = jnp.einsum("bqd,bkd->bqk", q, k,
                           preferred_element_type=jnp.float32) + add_mask
            s = s - jnp.max(s, axis=-1, keepdims=True)
            p = jnp.exp(s)
            p = p * pl.reciprocal(jnp.sum(p, axis=-1, keepdims=True), approx=True)
            ctx = jnp.einsum("bqk,bkd->bqd", p, v,
                             preferred_element_type=jnp.float32).reshape(n, head_dim)
            attn_out = attn_out + jnp.dot(
                ctx,
                hpack_ref[H_ATTN_O + hh * head_dim:H_ATTN_O + (hh + 1) * head_dim, 0:hid],
                preferred_element_type=jnp.float32)

        h1 = ln(h + attn_out, bias(B_ALN_G, hid), bias(B_ALN_B, hid))
        ffn = gelu_new(jnp.dot(h1, w(H_FFN_W, hid, INTER),
                               preferred_element_type=jnp.float32) + bias(B_FFN, INTER))
        ffn2 = jnp.dot(ffn, w(H_FFN_O, INTER, hid),
                       preferred_element_type=jnp.float32) + bias(B_FFN_O, hid)
        return ln(h1 + ffn2, bias(B_FLN_G, hid), bias(B_FLN_B, hid))

    # ALBERT: the same layer weights applied n_layers times (static trip count, unrolled)
    h = lax.fori_loop(0, n_layers, layer, h, unroll=True)

    # pooler on token 0 of each sequence: one-hot row select via MXU.  `rowpad` (>=8) extra
    # rows select nothing (their target column is out of range) -> sublane-dense intent tile.
    colsel = lax.broadcasted_iota(jnp.int32, (rowpad, n), 1)
    rowsel = lax.broadcasted_iota(jnp.int32, (rowpad, n), 0)
    sel = (colsel == rowsel * seq).astype(jnp.float32)              # (rowpad, n)
    cls = jnp.dot(sel, h, preferred_element_type=jnp.float32)       # (rowpad, hid)
    pooled = jnp.tanh(jnp.dot(cls, w(H_POOL, hid, hid),
                              preferred_element_type=jnp.float32) + bias(B_POOL, hid))

    # lane-dense (128-wide) classification heads
    intent_logits = jnp.dot(pooled, w(H_INTENT, hid, HEAD_PAD),
                            preferred_element_type=jnp.float32) + bias(B_INTENT, HEAD_PAD)
    slot_logits = jnp.dot(h, w(H_SLOT, hid, HEAD_PAD),
                          preferred_element_type=jnp.float32) + bias(B_SLOT, HEAD_PAD)
    return intent_logits, slot_logits


# ----------------------------- inference kernel -------------------------------
def _infer_kernel(epack_ref, hpack_ref, tok_ref, mask_ref,
                  intent_out_ref, slot_out_ref, *,
                  batch, seq, n_heads, head_dim, n_layers, eps, rowpad):
    il, sl = _encoder_core(epack_ref, hpack_ref, tok_ref, mask_ref,
                           batch=batch, seq=seq, n_heads=n_heads, head_dim=head_dim,
                           n_layers=n_layers, eps=eps, rowpad=rowpad)
    intent_out_ref[...] = il          # (rowpad, 128) full-tile store
    slot_out_ref[...] = sl            # (B*S, 128) lane-dense store


# ----------------------------- training kernel (encoder + fused joint CE loss) -
def _train_kernel(epack_ref, hpack_ref, tok_ref, mask_ref, tokmask_ref,
                  intent_y_ref, slot_y_ref, loss_ref, *,
                  batch, seq, n_heads, head_dim, n_layers, eps, rowpad,
                  n_intent, n_slot):
    il, sl = _encoder_core(epack_ref, hpack_ref, tok_ref, mask_ref,
                           batch=batch, seq=seq, n_heads=n_heads, head_dim=head_dim,
                           n_layers=n_layers, eps=eps, rowpad=rowpad)

    # ---- intent cross-entropy (mean over batch); padded rows/classes masked in-kernel
    il_b = il[0:batch, :]                                           # real batch rows
    icol = lax.broadcasted_iota(jnp.int32, (batch, HEAD_PAD), 1)
    il_m = jnp.where(icol < n_intent, il_b, -1e30)
    imax = jnp.max(il_m, axis=-1, keepdims=True)
    ilse = jnp.log(jnp.sum(jnp.exp(il_m - imax), axis=-1, keepdims=True)) + imax
    ioh = (icol == intent_y_ref[...]).astype(jnp.float32)           # (batch, 128)
    intent_loss = jnp.sum(ilse - jnp.sum(il_m * ioh, axis=-1, keepdims=True)) / batch

    # ---- slot cross-entropy over active (attention_mask == 1) tokens
    scol = lax.broadcasted_iota(jnp.int32, (batch * seq, HEAD_PAD), 1)
    sl_m = jnp.where(scol < n_slot, sl, -1e30)
    smax = jnp.max(sl_m, axis=-1, keepdims=True)
    slse = jnp.log(jnp.sum(jnp.exp(sl_m - smax), axis=-1, keepdims=True)) + smax
    soh = (scol == slot_y_ref[...]).astype(jnp.float32)
    snll = slse - jnp.sum(sl_m * soh, axis=-1, keepdims=True)       # (B*S, 1)
    mk = tokmask_ref[...]                                           # (B*S, 1)
    slot_loss = jnp.sum(snll * mk) / jnp.maximum(jnp.sum(mk), 1.0)  # guard all-padding batch

    loss_ref[0, 0] = intent_loss + slot_loss


# ----------------------------- cost estimate (scheduler hint) -----------------
def _cost_estimate(batch, seq, training):
    n = batch * seq
    rowpad = max(8, ((batch + 7) // 8) * 8)
    flops = 2 * n * EMB * (VOCAB + MAXPOS + NTYPES) + 2 * n * EMB * HID
    per_layer = (2 * n * HID * 3 * HID
                 + NHEADS * 4 * batch * seq * seq * HEAD_DIM
                 + 2 * n * HID * HID
                 + 2 * n * HID * INTER + 2 * n * INTER * HID)
    flops += NLAYERS * per_layer
    flops += 2 * rowpad * n * HID + 2 * rowpad * HID * HID
    flops += 2 * rowpad * HID * HEAD_PAD + 2 * n * HID * HEAD_PAD
    trans = NLAYERS * (NHEADS * batch * seq * seq + n * INTER) + rowpad * HID
    bytes_accessed = 4 * (E_ROWS * EMB + H_ROWS * 128 + 2 * n + batch * seq)
    if training:
        trans += (batch + n) * HEAD_PAD
        bytes_accessed += 4 * (n + batch + n + 1)
    else:
        bytes_accessed += 4 * (rowpad * HEAD_PAD + n * HEAD_PAD)
    return pl.CostEstimate(flops=flops, transcendentals=trans, bytes_accessed=bytes_accessed)


# ----------------------------- parameters & one-time packing ------------------
def init_params(key):
    def nrm(k, shape):
        return 0.02 * jax.random.normal(k, shape, jnp.float32)
    keys = jax.random.split(key, 32)
    ki = iter(keys)
    return {
        "word_emb": nrm(next(ki), (VOCAB, EMB)),
        "pos_emb": nrm(next(ki), (MAXPOS, EMB)),
        "type_emb": nrm(next(ki), (NTYPES, EMB)),
        "emb_ln_g": jnp.ones((EMB,), jnp.float32),
        "emb_ln_b": jnp.zeros((EMB,), jnp.float32),
        "emb_map_w": nrm(next(ki), (EMB, HID)),
        "emb_map_b": jnp.zeros((HID,), jnp.float32),
        # shared ALBERT layer
        "q_w": nrm(next(ki), (HID, HID)), "q_b": jnp.zeros((HID,), jnp.float32),
        "k_w": nrm(next(ki), (HID, HID)), "k_b": jnp.zeros((HID,), jnp.float32),
        "v_w": nrm(next(ki), (HID, HID)), "v_b": jnp.zeros((HID,), jnp.float32),
        "attn_o_w": nrm(next(ki), (HID, HID)), "attn_o_b": jnp.zeros((HID,), jnp.float32),
        "attn_ln_g": jnp.ones((HID,), jnp.float32), "attn_ln_b": jnp.zeros((HID,), jnp.float32),
        "ffn_w": nrm(next(ki), (HID, INTER)), "ffn_b": jnp.zeros((INTER,), jnp.float32),
        "ffn_o_w": nrm(next(ki), (INTER, HID)), "ffn_o_b": jnp.zeros((HID,), jnp.float32),
        "ffn_ln_g": jnp.ones((HID,), jnp.float32), "ffn_ln_b": jnp.zeros((HID,), jnp.float32),
        "pooler_w": nrm(next(ki), (HID, HID)), "pooler_b": jnp.zeros((HID,), jnp.float32),
        # heads
        "intent_w": nrm(next(ki), (HID, N_INTENT)), "intent_b": jnp.zeros((N_INTENT,), jnp.float32),
        "slot_w": nrm(next(ki), (HID, N_SLOT)), "slot_b": jnp.zeros((N_SLOT,), jnp.float32),
    }


def pack_params(p):
    """One-time weight packing: fused + pre-scaled QKV, lane-padded heads, and everything
    concatenated into two contiguous slabs (2 input DMAs instead of ~24 tiny ones)."""
    scale = 1.0 / math.sqrt(HEAD_DIM)
    qkv_w = jnp.concatenate([p["q_w"] * scale, p["k_w"], p["v_w"]], axis=1)   # (HID, 3*HID)
    qkv_b = jnp.concatenate([p["q_b"] * scale, p["k_b"], p["v_b"]], axis=0)   # (3*HID,)

    def lane_pad(m):
        return jnp.pad(m, ((0, 0), (0, 128 - m.shape[1])))

    def blk(m, rows):
        return jnp.pad(lane_pad(m), ((0, rows - m.shape[0]), (0, 0)))

    def bias_row(v):
        return jnp.pad(v, (0, 128 - v.shape[0]))[None, :]

    bias_rows = jnp.concatenate([
        bias_row(p["emb_map_b"]), bias_row(qkv_b), bias_row(p["attn_o_b"]),
        bias_row(p["attn_ln_g"]), bias_row(p["attn_ln_b"]), bias_row(p["ffn_b"]),
        bias_row(p["ffn_o_b"]), bias_row(p["ffn_ln_g"]), bias_row(p["ffn_ln_b"]),
        bias_row(p["pooler_b"]), bias_row(p["intent_b"]), bias_row(p["slot_b"]),
    ], axis=0)                                                   # (12, 128)

    hpack = jnp.concatenate([
        blk(p["emb_map_w"], H_QKV - H_EMB_MAP),                  # rows   0.. 15
        blk(qkv_w, H_ATTN_O - H_QKV),                            # rows  16.. 47
        blk(p["attn_o_w"], H_FFN_W - H_ATTN_O),                  # rows  48.. 79
        blk(p["ffn_w"], H_FFN_O - H_FFN_W),                      # rows  80..111
        blk(p["ffn_o_w"], H_POOL - H_FFN_O),                     # rows 112..175
        blk(p["pooler_w"], H_INTENT - H_POOL),                   # rows 176..207
        blk(p["intent_w"], H_SLOT - H_INTENT),                   # rows 208..239
        blk(p["slot_w"], H_BIAS - H_SLOT),                       # rows 240..271
        bias_rows,                                               # rows 272..283
    ], axis=0)
    hpack = jnp.pad(hpack, ((0, H_ROWS - hpack.shape[0]), (0, 0)))

    epack = jnp.concatenate([
        jnp.pad(p["word_emb"], ((0, E_POS - VOCAB), (0, 0))),            # rows   0..103
        p["pos_emb"],                                                    # rows 104..167
        jnp.pad(p["type_emb"], ((0, E_LN_G - E_TYPE - NTYPES), (0, 0))), # rows 168..175
        p["emb_ln_g"][None, :],                                          # row 176
        p["emb_ln_b"][None, :],                                          # row 177
    ], axis=0)
    epack = jnp.pad(epack, ((0, E_ROWS - epack.shape[0]), (0, 0)))

    return {"epack": epack, "hpack": hpack}


# ----------------------------- jitted forward paths ----------------------------
def _consts(batch, seq):
    return dict(batch=batch, seq=seq, n_heads=NHEADS, head_dim=HEAD_DIM,
                n_layers=NLAYERS, eps=LN_EPS,
                rowpad=max(8, ((batch + 7) // 8) * 8))


@jax.jit
def _forward_logits(packed, input_ids, attention_mask, token_type_ids):
    batch, seq = input_ids.shape
    c = _consts(batch, seq)
    tok = jnp.stack([input_ids.reshape(-1), token_type_ids.reshape(-1)], axis=1).astype(jnp.int32)
    mask = attention_mask.astype(jnp.float32)
    # TODO(synk): if batch/seq grow, add a batch grid with dimension_semantics=("parallel",)
    # so both v7x TensorCores are used; pointless at B=2/S=8.
    intent_pad, slot_pad = pl.pallas_call(
        functools.partial(_infer_kernel, **c),
        out_shape=(jax.ShapeDtypeStruct((c["rowpad"], HEAD_PAD), jnp.float32),
                   jax.ShapeDtypeStruct((batch * seq, HEAD_PAD), jnp.float32)),
        cost_estimate=_cost_estimate(batch, seq, training=False),
    )(packed["epack"], packed["hpack"], tok, mask)
    intent_output = intent_pad[:batch, :N_INTENT]
    slot_output = slot_pad[:, :N_SLOT].reshape(batch, seq, N_SLOT)
    return intent_output, slot_output


@jax.jit
def _forward_loss(packed, input_ids, attention_mask, token_type_ids,
                  intent_label_ids, slot_labels_ids):
    batch, seq = input_ids.shape
    c = _consts(batch, seq)
    tok = jnp.stack([input_ids.reshape(-1), token_type_ids.reshape(-1)], axis=1).astype(jnp.int32)
    mask = attention_mask.astype(jnp.float32)
    tok_mask = mask.reshape(batch * seq, 1)
    loss = pl.pallas_call(
        functools.partial(_train_kernel, n_intent=N_INTENT, n_slot=N_SLOT, **c),
        out_shape=jax.ShapeDtypeStruct((1, 1), jnp.float32),
        cost_estimate=_cost_estimate(batch, seq, training=True),
    )(packed["epack"], packed["hpack"], tok, mask, tok_mask,
      intent_label_ids.reshape(-1, 1).astype(jnp.int32),
      slot_labels_ids.reshape(-1, 1).astype(jnp.int32))
    return loss[0, 0]


def joint_bert_forward(packed, input_ids, attention_mask, token_type_ids,
                       intent_label_ids=None, slot_labels_ids=None):
    if intent_label_ids is not None and slot_labels_ids is not None:
        return _forward_loss(packed, input_ids, attention_mask, token_type_ids,
                             intent_label_ids, slot_labels_ids)
    return _forward_logits(packed, input_ids, attention_mask, token_type_ids)


# ----------------------------- main -------------------------------------------
if __name__ == "__main__":
    key = jax.random.PRNGKey(0)
    kp, k1, k2, k3 = jax.random.split(key, 4)

    params = init_params(kp)
    packed = pack_params(params)     # one-time packing (per perf review)

    input_ids = jax.random.randint(k1, (B, S), 0, VOCAB, dtype=jnp.int32)
    token_type_ids = jnp.zeros((B, S), jnp.int32)
    attention_mask = jnp.array(
        [[1] * S, [1] * (S - 3) + [0] * 3], dtype=jnp.int32)     # second row padded
    intent_label_ids = jax.random.randint(k2, (B,), 0, N_INTENT, dtype=jnp.int32)
    slot_labels_ids = jax.random.randint(k3, (B, S), 0, N_SLOT, dtype=jnp.int32)

    # inference path (logits)
    intent_logits, slot_logits = joint_bert_forward(
        packed, input_ids, attention_mask, token_type_ids)
    jax.block_until_ready((intent_logits, slot_logits))
    assert intent_logits.shape == (B, N_INTENT)
    assert slot_logits.shape == (B, S, N_SLOT)

    # training path (joint CE loss, fused into the encoder kernel)
    total_loss = joint_bert_forward(
        packed, input_ids, attention_mask, token_type_ids,
        intent_label_ids, slot_labels_ids)
    total_loss = jax.block_until_ready(total_loss)
    assert jnp.isfinite(total_loss)

    print("KERNEL_OK")
</pallas_src>

<mosaic_0001>
module attributes {stable_mosaic.version = 11 : i64} {
  func.func @_infer_kernel(%arg0: memref<184x16xf32, #tpu.memory_space<vmem>>, %arg1: memref<288x128xf32, #tpu.memory_space<vmem>>, %arg2: memref<16x2xi32, #tpu.memory_space<vmem>>, %arg3: memref<2x8xf32, #tpu.memory_space<vmem>>, %arg4: memref<8x128xf32, #tpu.memory_space<vmem>>, %arg5: memref<16x128xf32, #tpu.memory_space<vmem>>) attributes {dimension_semantics = [], scalar_prefetch = 0 : i64, scratch_operands = 0 : i64, tpu.core_type = #tpu.core_type<tc>} {
    %c0 = arith.constant 0 : index
    %c0_0 = arith.constant 0 : index
    %0 = vector.load %arg2[%c0, %c0_0] : memref<16x2xi32, #tpu.memory_space<vmem>>, vector<16x2xi32>
    %1 = vector.extract_strided_slice %0 {offsets = [0, 0], sizes = [16, 1], strides = [1, 1]} : vector<16x2xi32> to vector<16x1xi32>
    %2 = vector.extract_strided_slice %0 {offsets = [0, 1], sizes = [16, 1], strides = [1, 1]} : vector<16x2xi32> to vector<16x1xi32>
    %3 = tpu.iota {dimensions = array<i32: 1>} : vector<16x100xi32>
    %4 = vector.broadcast %1 : vector<16x1xi32> to vector<16x100xi32>
    %5 = arith.cmpi eq, %3, %4 : vector<16x100xi32>
    %6 = arith.extui %5 : vector<16x100xi1> to vector<16x100xi32>
    %7 = arith.sitofp %6 : vector<16x100xi32> to vector<16x100xf32>
    %c0_1 = arith.constant 0 : index
    %c0_2 = arith.constant 0 : index
    %8 = vector.load %arg0[%c0_1, %c0_2] : memref<184x16xf32, #tpu.memory_space<vmem>>, vector<100x16xf32>
    %cst = arith.constant dense<0.000000e+00> : vector<16x16xf32>
    %9 = tpu.matmul %7, %8, %cst {dimension_numbers = #tpu.dot_dimension_numbers<[1], [0], [0], [1], [0, 0, 1, 1], [], []>} : vector<16x100xf32>, vector<100x16xf32>, vector<16x16xf32> -> vector<16x16xf32>
    %10 = tpu.iota {dimensions = array<i32: 1>} : vector<2x8x64xi32>
    %11 = tpu.iota {dimensions = array<i32: 2>} : vector<2x8x64xi32>
    %12 = arith.cmpi eq, %11, %10 : vector<2x8x64xi32>
    %13 = arith.extui %12 : vector<2x8x64xi1> to vector<2x8x64xi32>
    %14 = arith.sitofp %13 : vector<2x8x64xi32> to vector<2x8x64xf32>
    %15 = vector.shape_cast %14 : vector<2x8x64xf32> to vector<16x64xf32>
    %c104 = arith.constant 104 : index
    %c0_3 = arith.constant 0 : index
    %16 = vector.load %arg0[%c104, %c0_3] : memref<184x16xf32, #tpu.memory_space<vmem>>, vector<64x16xf32>
    %cst_4 = arith.constant dense<0.000000e+00> : vector<16x16xf32>
    %17 = tpu.matmul %15, %16, %cst_4 {dimension_numbers = #tpu.dot_dimension_numbers<[1], [0], [0], [1], [0, 0, 1, 1], [], []>} : vector<16x64xf32>, vector<64x16xf32>, vector<16x16xf32> -> vector<16x16xf32>
    %18 = tpu.iota {dimensions = array<i32: 1>} : vector<16x2xi32>
    %19 = vector.broadcast %2 : vector<16x1xi32> to vector<16x2xi32>
    %20 = arith.cmpi eq, %18, %19 : vector<16x2xi32>
    %21 = arith.extui %20 : vector<16x2xi1> to vector<16x2xi32>
    %22 = arith.sitofp %21 : vector<16x2xi32> to vector<16x2xf32>
    %c168 = arith.constant 168 : index
    %c0_5 = arith.constant 0 : index
    %23 = vector.load %arg0[%c168, %c0_5] : memref<184x16xf32, #tpu.memory_space<vmem>>, vector<2x16xf32>
    %cst_6 = arith.constant dense<0.000000e+00> : vector<16x16xf32>
    %24 = tpu.matmul %22, %23, %cst_6 {dimension_numbers = #tpu.dot_dimension_numbers<[1], [0], [0], [1], [0, 0, 1, 1], [], []>} : vector<16x2xf32>, vector<2x16xf32>, vector<16x16xf32> -> vector<16x16xf32>
    %25 = arith.addf %9, %17 : vector<16x16xf32>
    %26 = arith.addf %25, %24 : vector<16x16xf32>
    %c176 = arith.constant 176 : index
    %c0_7 = arith.constant 0 : index
    %27 = vector.load %arg0[%c176, %c0_7] : memref<184x16xf32, #tpu.memory_space<vmem>>, vector<1x16xf32>
    %c177 = arith.constant 177 : index
    %c0_8 = arith.constant 0 : index
    %28 = vector.load %arg0[%c177, %c0_8] : memref<184x16xf32, #tpu.memory_space<vmem>>, vector<1x16xf32>
    %cst_9 = arith.constant dense<0.000000e+00> : vector<16xf32>
    %29 = vector.multi_reduction <add>, %26, %cst_9 [1] : vector<16x16xf32> to vector<16xf32>
    %30 = vector.shape_cast %29 : vector<16xf32> to vector<16x1xf32>
    %cst_10 = arith.constant 1.600000e+01 : f32
    %31 = vector.broadcast %cst_10 : f32 to vector<16x1xf32>
    %32 = arith.divf %30, %31 : vector<16x1xf32>
    %33 = vector.broadcast %32 : vector<16x1xf32> to vector<16x16xf32>
    %34 = arith.subf %26, %33 : vector<16x16xf32>
    %35 = arith.mulf %34, %34 : vector<16x16xf32>
    %cst_11 = arith.constant dense<0.000000e+00> : vector<16xf32>
    %36 = vector.multi_reduction <add>, %35, %cst_11 [1] : vector<16x16xf32> to vector<16xf32>
    %37 = vector.shape_cast %36 : vector<16xf32> to vector<16x1xf32>
    %cst_12 = arith.constant 1.600000e+01 : f32
    %38 = vector.broadcast %cst_12 : f32 to vector<16x1xf32>
    %39 = arith.divf %37, %38 : vector<16x1xf32>
    %40 = vector.broadcast %32 : vector<16x1xf32> to vector<16x16xf32>
    %41 = arith.subf %26, %40 : vector<16x16xf32>
    %cst_13 = arith.constant 9.99999996E-13 : f32
    %42 = vector.broadcast %cst_13 : f32 to vector<16x1xf32>
    %43 = arith.addf %39, %42 : vector<16x1xf32>
    %44 = math.rsqrt %43 : vector<16x1xf32>
    %45 = vector.broadcast %44 : vector<16x1xf32> to vector<16x16xf32>
    %46 = arith.mulf %41, %45 : vector<16x16xf32>
    %47 = vector.broadcast %27 : vector<1x16xf32> to vector<16x16xf32>
    %48 = arith.mulf %46, %47 : vector<16x16xf32>
    %49 = vector.broadcast %28 : vector<1x16xf32> to vector<16x16xf32>
    %50 = arith.addf %48, %49 : vector<16x16xf32>
    %c0_14 = arith.constant 0 : index
    %c0_15 = arith.constant 0 : index
    %51 = vector.load %arg1[%c0_14, %c0_15] : memref<288x128xf32, #tpu.memory_space<vmem>>, vector<16x32xf32>
    %cst_16 = arith.constant dense<0.000000e+00> : vector<16x32xf32>
    %52 = tpu.matmul %50, %51, %cst_16 {dimension_numbers = #tpu.dot_dimension_numbers<[1], [0], [0], [1], [0, 0, 1, 1], [], []>} : vector<16x16xf32>, vector<16x32xf32>, vector<16x32xf32> -> vector<16x32xf32>
    %c272 = arith.constant 272 : index
    %c0_17 = arith.constant 0 : index
    %53 = vector.load %arg1[%c272, %c0_17] : memref<288x128xf32, #tpu.memory_space<vmem>>, vector<1x32xf32>
    %54 = vector.broadcast %53 : vector<1x32xf32> to vector<16x32xf32>
    %55 = arith.addf %52, %54 : vector<16x32xf32>
    %c0_18 = arith.constant 0 : index
    %c0_19 = arith.constant 0 : index
    %56 = vector.load %arg3[%c0_18, %c0_19] : memref<2x8xf32, #tpu.memory_space<vmem>>, vector<2x8xf32>
    %cst_20 = arith.constant 1.000000e+00 : f32
    %57 = vector.broadcast %cst_20 : f32 to vector<2x8xf32>
    %58 = arith.subf %57, %56 : vector<2x8xf32>
    %cst_21 = arith.constant -1.000000e+09 : f32
    %59 = vector.broadcast %cst_21 : f32 to vector<2x8xf32>
    %60 = arith.mulf %58, %59 : vector<2x8xf32>
    %61 = vector.shape_cast %60 : vector<2x8xf32> to vector<2x1x8xf32>
    %c0_i32 = arith.constant 0 : i32
    %c16 = arith.constant 16 : index
    %c0_22 = arith.constant 0 : index
    %62 = vector.load %arg1[%c16, %c0_22] : memref<288x128xf32, #tpu.memory_space<vmem>>, vector<32x96xf32>
    %cst_23 = arith.constant dense<0.000000e+00> : vector<16x96xf32>
    %63 = tpu.matmul %55, %62, %cst_23 {dimension_numbers = #tpu.dot_dimension_numbers<[1], [0], [0], [1], [0, 0, 1, 1], [], []>} : vector<16x32xf32>, vector<32x96xf32>, vector<16x96xf32> -> vector<16x96xf32>
    %c273 = arith.constant 273 : index
    %c0_24 = arith.constant 0 : index
    %64 = vector.load %arg1[%c273, %c0_24] : memref<288x128xf32, #tpu.memory_space<vmem>>, vector<1x96xf32>
    %65 = vector.broadcast %64 : vector<1x96xf32> to vector<16x96xf32>
    %66 = arith.addf %63, %65 : vector<16x96xf32>
    %67 = vector.shape_cast %66 : vector<16x96xf32> to vector<2x8x96xf32>
    %c274 = arith.constant 274 : index
    %c0_25 = arith.constant 0 : index
    %68 = vector.load %arg1[%c274, %c0_25] : memref<288x128xf32, #tpu.memory_space<vmem>>, vector<1x32xf32>
    %69 = vector.extract_strided_slice %67 {offsets = [0, 0, 0], sizes = [2, 8, 16], strides = [1, 1, 1]} : vector<2x8x96xf32> to vector<2x8x16xf32>
    %70 = vector.extract_strided_slice %67 {offsets = [0, 0, 32], sizes = [2, 8, 16], strides = [1, 1, 1]} : vector<2x8x96xf32> to vector<2x8x16xf32>
    %71 = vector.extract_strided_slice %67 {offsets = [0, 0, 64], sizes = [2, 8, 16], strides = [1, 1, 1]} : vector<2x8x96xf32> to vector<2x8x16xf32>
    "tpu.trace_start"() <{level = 10 : i32, message = "bqd,bkd->bqk"}> : () -> ()
    %cst_26 = arith.constant dense<0.000000e+00> : vector<2x8x8xf32>
    %72 = tpu.matmul %69, %70, %cst_26 {dimension_numbers = #tpu.dot_dimension_numbers<[2], [2], [1], [1], [0, 0, 0, 1, 1, 1], [0], [0]>} : vector<2x8x16xf32>, vector<2x8x16xf32>, vector<2x8x8xf32> -> vector<2x8x8xf32>
    "tpu.trace_stop"() : () -> ()
    %73 = vector.broadcast %61 : vector<2x1x8xf32> to vector<2x8x8xf32>
    %74 = arith.addf %72, %73 : vector<2x8x8xf32>
    %cst_27 = arith.constant dense<0xFF800000> : vector<2x8xf32>
    %75 = vector.multi_reduction <maximumf>, %74, %cst_27 [2] : vector<2x8x8xf32> to vector<2x8xf32>
    %76 = vector.shape_cast %75 : vector<2x8xf32> to vector<2x8x1xf32>
    %77 = vector.broadcast %76 : vector<2x8x1xf32> to vector<2x8x8xf32>
    %78 = arith.subf %74, %77 : vector<2x8x8xf32>
    %79 = math.exp %78 : vector<2x8x8xf32>
    %cst_28 = arith.constant dense<0.000000e+00> : vector<2x8xf32>
    %80 = vector.multi_reduction <add>, %79, %cst_28 [2] : vector<2x8x8xf32> to vector<2x8xf32>
    %81 = vector.shape_cast %80 : vector<2x8xf32> to vector<2x8x1xf32>
    %82 = tpu.reciprocal %81 {approx = true} : vector<2x8x1xf32> -> vector<2x8x1xf32>
    %83 = vector.broadcast %82 : vector<2x8x1xf32> to vector<2x8x8xf32>
    %84 = arith.mulf %79, %83 : vector<2x8x8xf32>
    "tpu.trace_start"() <{level = 10 : i32, message = "bqk,bkd->bqd"}> : () -> ()
    %cst_29 = arith.constant dense<0.000000e+00> : vector<2x8x16xf32>
    %85 = tpu.matmul %84, %71, %cst_29 {dimension_numbers = #tpu.dot_dimension_numbers<[2], [1], [1], [2], [0, 0, 0, 1, 1, 2], [0], [0]>} : vector<2x8x8xf32>, vector<2x8x16xf32>, vector<2x8x16xf32> -> vector<2x8x16xf32>
    "tpu.trace_stop"() : () -> ()
    %86 = vector.shape_cast %85 : vector<2x8x16xf32> to vector<16x16xf32>
    %c48 = arith.constant 48 : index
    %c0_30 = arith.constant 0 : index
    %87 = vector.load %arg1[%c48, %c0_30] : memref<288x128xf32, #tpu.memory_space<vmem>>, vector<16x32xf32>
    %cst_31 = arith.constant dense<0.000000e+00> : vector<16x32xf32>
    %88 = tpu.matmul %86, %87, %cst_31 {dimension_numbers = #tpu.dot_dimension_numbers<[1], [0], [0], [1], [0, 0, 1, 1], [], []>} : vector<16x16xf32>, vector<16x32xf32>, vector<16x32xf32> -> vector<16x32xf32>
    %89 = vector.broadcast %68 : vector<1x32xf32> to vector<16x32xf32>
    %90 = arith.addf %89, %88 : vector<16x32xf32>
    %91 = vector.extract_strided_slice %67 {offsets = [0, 0, 16], sizes = [2, 8, 16], strides = [1, 1, 1]} : vector<2x8x96xf32> to vector<2x8x16xf32>
    %92 = vector.extract_strided_slice %67 {offsets = [0, 0, 48], sizes = [2, 8, 16], strides = [1, 1, 1]} : vector<2x8x96xf32> to vector<2x8x16xf32>
    %93 = vector.extract_strided_slice %67 {offsets = [0, 0, 80], sizes = [2, 8, 16], strides = [1, 1, 1]} : vector<2x8x96xf32> to vector<2x8x16xf32>
    "tpu.trace_start"() <{level = 10 : i32, message = "bqd,bkd->bqk"}> : () -> ()
    %cst_32 = arith.constant dense<0.000000e+00> : vector<2x8x8xf32>
    %94 = tpu.matmul %91, %92, %cst_32 {dimension_numbers = #tpu.dot_dimension_numbers<[2], [2], [1], [1], [0, 0, 0, 1, 1, 1], [0], [0]>} : vector<2x8x16xf32>, vector<2x8x16xf32>, vector<2x8x8xf32> -> vector<2x8x8xf32>
    "tpu.trace_stop"() : () -> ()
    %95 = vector.broadcast %61 : vector<2x1x8xf32> to vector<2x8x8xf32>
    %96 = arith.addf %94, %95 : vector<2x8x8xf32>
    %cst_33 = arith.constant dense<0xFF800000> : vector<2x8xf32>
    %97 = vector.multi_reduction <maximumf>, %96, %cst_33 [2] : vector<2x8x8xf32> to vector<2x8xf32>
    %98 = vector.shape_cast %97 : vector<2x8xf32> to vector<2x8x1xf32>
    %99 = vector.broadcast %98 : vector<2x8x1xf32> to vector<2x8x8xf32>
    %100 = arith.subf %96, %99 : vector<2x8x8xf32>
    %101 = math.exp %100 : vector<2x8x8xf32>
    %cst_34 = arith.constant dense<0.000000e+00> : vector<2x8xf32>
    %102 = vector.multi_reduction <add>, %101, %cst_34 [2] : vector<2x8x8xf32> to vector<2x8xf32>
    %103 = vector.shape_cast %102 : vector<2x8xf32> to vector<2x8x1xf32>
    %104 = tpu.reciprocal %103 {approx = true} : vector<2x8x1xf32> -> vector<2x8x1xf32>
    %105 = vector.broadcast %104 : vector<2x8x1xf32> to vector<2x8x8xf32>
    %106 = arith.mulf %101, %105 : vector<2x8x8xf32>
    "tpu.trace_start"() <{level = 10 : i32, message = "bqk,bkd->bqd"}> : () -> ()
    %cst_35 = arith.constant dense<0.000000e+00> : vector<2x8x16xf32>
    %107 = tpu.matmul %106, %93, %cst_35 {dimension_numbers = #tpu.dot_dimension_numbers<[2], [1], [1], [2], [0, 0, 0, 1, 1, 2], [0], [0]>} : vector<2x8x8xf32>, vector<2x8x16xf32>, vector<2x8x16xf32> -> vector<2x8x16xf32>
    "tpu.trace_stop"() : () -> ()
    %108 = vector.shape_cast %107 : vector<2x8x16xf32> to vector<16x16xf32>
    %c64 = arith.constant 64 : index
    %c0_36 = arith.constant 0 : index
    %109 = vector.load %arg1[%c64, %c0_36] : memref<288x128xf32, #tpu.memory_space<vmem>>, vector<16x32xf32>
    %cst_37 = arith.constant dense<0.000000e+00> : vector<16x32xf32>
    %110 = tpu.matmul %108, %109, %cst_37 {dimension_numbers = #tpu.dot_dimension_numbers<[1], [0], [0], [1], [0, 0, 1, 1], [], []>} : vector<16x16xf32>, vector<16x32xf32>, vector<16x32xf32> -> vector<16x32xf32>
    %111 = arith.addf %90, %110 : vector<16x32xf32>
    %112 = arith.addf %55, %111 : vector<16x32xf32>
    %c275 = arith.constant 275 : index
    %c0_38 = arith.constant 0 : index
    %113 = vector.load %arg1[%c275, %c0_38] : memref<288x128xf32, #tpu.memory_space<vmem>>, vector<1x32xf32>
    %c276 = arith.constant 276 : index
    %c0_39 = arith.constant 0 : index
    %114 = vector.load %arg1[%c276, %c0_39] : memref<288x128xf32, #tpu.memory_space<vmem>>, vector<1x32xf32>
    %cst_40 = arith.constant dense<0.000000e+00> : vector<16xf32>
    %115 = vector.multi_reduction <add>, %112, %cst_40 [1] : vector<16x32xf32> to vector<16xf32>
    %116 = vector.shape_cast %115 : vector<16xf32> to vector<16x1xf32>
    %cst_41 = arith.constant 3.200000e+01 : f32
    %117 = vector.broadcast %cst_41 : f32 to vector<16x1xf32>
    %118 = arith.divf %116, %117 : vector<16x1xf32>
    %119 = vector.broadcast %118 : vector<16x1xf32> to vector<16x32xf32>
    %120 = arith.subf %112, %119 : vector<16x32xf32>
    %121 = arith.mulf %120, %120 : vector<16x32xf32>
    %cst_42 = arith.constant dense<0.000000e+00> : vector<16xf32>
    %122 = vector.multi_reduction <add>, %121, %cst_42 [1] : vector<16x32xf32> to vector<16xf32>
    %123 = vector.shape_cast %122 : vector<16xf32> to vector<16x1xf32>
    %cst_43 = arith.constant 3.200000e+01 : f32
    %124 = vector.broadcast %cst_43 : f32 to vector<16x1xf32>
    %125 = arith.divf %123, %124 : vector<16x1xf32>
    %126 = vector.broadcast %118 : vector<16x1xf32> to vector<16x32xf32>
    %127 = arith.subf %112, %126 : vector<16x32xf32>
    %cst_44 = arith.constant 9.99999996E-13 : f32
    %128 = vector.broadcast %cst_44 : f32 to vector<16x1xf32>
    %129 = arith.addf %125, %128 : vector<16x1xf32>
    %130 = math.rsqrt %129 : vector<16x1xf32>
    %131 = vector.broadcast %130 : vector<16x1xf32> to vector<16x32xf32>
    %132 = arith.mulf %127, %131 : vector<16x32xf32>
    %133 = vector.broadcast %113 : vector<1x32xf32> to vector<16x32xf32>
    %134 = arith.mulf %132, %133 : vector<16x32xf32>
    %135 = vector.broadcast %114 : vector<1x32xf32> to vector<16x32xf32>
    %136 = arith.addf %134, %135 : vector<16x32xf32>
    %c80 = arith.constant 80 : index
    %c0_45 = arith.constant 0 : index
    %137 = vector.load %arg1[%c80, %c0_45] : memref<288x128xf32, #tpu.memory_space<vmem>>, vector<32x64xf32>
    %cst_46 = arith.constant dense<0.000000e+00> : vector<16x64xf32>
    %138 = tpu.matmul %136, %137, %cst_46 {dimension_numbers = #tpu.dot_dimension_numbers<[1], [0], [0], [1], [0, 0, 1, 1], [], []>} : vector<16x32xf32>, vector<32x64xf32>, vector<16x64xf32> -> vector<16x64xf32>
    %c277 = arith.constant 277 : index
    %c0_47 = arith.constant 0 : index
    %139 = vector.load %arg1[%c277, %c0_47] : memref<288x128xf32, #tpu.memory_space<vmem>>, vector<1x64xf32>
    %140 = vector.broadcast %139 : vector<1x64xf32> to vector<16x64xf32>
    %141 = arith.addf %138, %140 : vector<16x64xf32>
    %cst_48 = arith.constant 5.000000e-01 : f32
    %142 = vector.broadcast %cst_48 : f32 to vector<16x64xf32>
    %143 = arith.mulf %142, %141 : vector<16x64xf32>
    %cst_49 = arith.constant 4.471500e-02 : f32
    %144 = vector.broadcast %cst_49 : f32 to vector<16x64xf32>
    %145 = arith.mulf %144, %141 : vector<16x64xf32>
    %146 = arith.mulf %145, %141 : vector<16x64xf32>
    %147 = arith.mulf %146, %141 : vector<16x64xf32>
    %148 = arith.addf %141, %147 : vector<16x64xf32>
    %cst_50 = arith.constant 0.797884583 : f32
    %149 = vector.broadcast %cst_50 : f32 to vector<16x64xf32>
    %150 = arith.mulf %149, %148 : vector<16x64xf32>
    %151 = math.tanh %150 : vector<16x64xf32>
    %cst_51 = arith.constant 1.000000e+00 : f32
    %152 = vector.broadcast %cst_51 : f32 to vector<16x64xf32>
    %153 = arith.addf %152, %151 : vector<16x64xf32>
    %154 = arith.mulf %143, %153 : vector<16x64xf32>
    %c112 = arith.constant 112 : index
    %c0_52 = arith.constant 0 : index
    %155 = vector.load %arg1[%c112, %c0_52] : memref<288x128xf32, #tpu.memory_space<vmem>>, vector<64x32xf32>
    %cst_53 = arith.constant dense<0.000000e+00> : vector<16x32xf32>
    %156 = tpu.matmul %154, %155, %cst_53 {dimension_numbers = #tpu.dot_dimension_numbers<[1], [0], [0], [1], [0, 0, 1, 1], [], []>} : vector<16x64xf32>, vector<64x32xf32>, vector<16x32xf32> -> vector<16x32xf32>
    %c278 = arith.constant 278 : index
    %c0_54 = arith.constant 0 : index
    %157 = vector.load %arg1[%c278, %c0_54] : memref<288x128xf32, #tpu.memory_space<vmem>>, vector<1x32xf32>
    %158 = vector.broadcast %157 : vector<1x32xf32> to vector<16x32xf32>
    %159 = arith.addf %156, %158 : vector<16x32xf32>
    %160 = arith.addf %136, %159 : vector<16x32xf32>
    %c279 = arith.constant 279 : index
    %c0_55 = arith.constant 0 : index
    %161 = vector.load %arg1[%c279, %c0_55] : memref<288x128xf32, #tpu.memory_space<vmem>>, vector<1x32xf32>
    %c280 = arith.constant 280 : index
    %c0_56 = arith.constant 0 : index
    %162 = vector.load %arg1[%c280, %c0_56] : memref<288x128xf32, #tpu.memory_space<vmem>>, vector<1x32xf32>
    %cst_57 = arith.constant dense<0.000000e+00> : vector<16xf32>
    %163 = vector.multi_reduction <add>, %160, %cst_57 [1] : vector<16x32xf32> to vector<16xf32>
    %164 = vector.shape_cast %163 : vector<16xf32> to vector<16x1xf32>
    %cst_58 = arith.constant 3.200000e+01 : f32
    %165 = vector.broadcast %cst_58 : f32 to vector<16x1xf32>
    %166 = arith.divf %164, %165 : vector<16x1xf32>
    %167 = vector.broadcast %166 : vector<16x1xf32> to vector<16x32xf32>
    %168 = arith.subf %160, %167 : vector<16x32xf32>
    %169 = arith.mulf %168, %168 : vector<16x32xf32>
    %cst_59 = arith.constant dense<0.000000e+00> : vector<16xf32>
    %170 = vector.multi_reduction <add>, %169, %cst_59 [1] : vector<16x32xf32> to vector<16xf32>
    %171 = vector.shape_cast %170 : vector<16xf32> to vector<16x1xf32>
    %cst_60 = arith.constant 3.200000e+01 : f32
    %172 = vector.broadcast %cst_60 : f32 to vector<16x1xf32>
    %173 = arith.divf %171, %172 : vector<16x1xf32>
    %174 = vector.broadcast %166 : vector<16x1xf32> to vector<16x32xf32>
    %175 = arith.subf %160, %174 : vector<16x32xf32>
    %cst_61 = arith.constant 9.99999996E-13 : f32
    %176 = vector.broadcast %cst_61 : f32 to vector<16x1xf32>
    %177 = arith.addf %173, %176 : vector<16x1xf32>
    %178 = math.rsqrt %177 : vector<16x1xf32>
    %179 = vector.broadcast %178 : vector<16x1xf32> to vector<16x32xf32>
    %180 = arith.mulf %175, %179 : vector<16x32xf32>
    %181 = vector.broadcast %161 : vector<1x32xf32> to vector<16x32xf32>
    %182 = arith.mulf %180, %181 : vector<16x32xf32>
    %183 = vector.broadcast %162 : vector<1x32xf32> to vector<16x32xf32>
    %184 = arith.addf %182, %183 : vector<16x32xf32>
    %c1_i32 = arith.constant 1 : i32
    %c16_62 = arith.constant 16 : index
    %c0_63 = arith.constant 0 : index
    %185 = vector.load %arg1[%c16_62, %c0_63] : memref<288x128xf32, #tpu.memory_space<vmem>>, vector<32x96xf32>
    %cst_64 = arith.constant dense<0.000000e+00> : vector<16x96xf32>
    %186 = tpu.matmul %184, %185, %cst_64 {dimension_numbers = #tpu.dot_dimension_numbers<[1], [0], [0], [1], [0, 0, 1, 1], [], []>} : vector<16x32xf32>, vector<32x96xf32>, vector<16x96xf32> -> vector<16x96xf32>
    %c273_65 = arith.constant 273 : index
    %c0_66 = arith.constant 0 : index
    %187 = vector.load %arg1[%c273_65, %c0_66] : memref<288x128xf32, #tpu.memory_space<vmem>>, vector<1x96xf32>
    %188 = vector.broadcast %187 : vector<1x96xf32> to vector<16x96xf32>
    %189 = arith.addf %186, %188 : vector<16x96xf32>
    %190 = vector.shape_cast %189 : vector<16x96xf32> to vector<2x8x96xf32>
    %c274_67 = arith.constant 274 : index
    %c0_68 = arith.constant 0 : index
    %191 = vector.load %arg1[%c274_67, %c0_68] : memref<288x128xf32, #tpu.memory_space<vmem>>, vector<1x32xf32>
    %192 = vector.extract_strided_slice %190 {offsets = [0, 0, 0], sizes = [2, 8, 16], strides = [1, 1, 1]} : vector<2x8x96xf32> to vector<2x8x16xf32>
    %193 = vector.extract_strided_slice %190 {offsets = [0, 0, 32], sizes = [2, 8, 16], strides = [1, 1, 1]} : vector<2x8x96xf32> to vector<2x8x16xf32>
    %194 = vector.extract_strided_slice %190 {offsets = [0, 0, 64], sizes = [2, 8, 16], strides = [1, 1, 1]} : vector<2x8x96xf32> to vector<2x8x16xf32>
    "tpu.trace_start"() <{level = 10 : i32, message = "bqd,bkd->bqk"}> : () -> ()
    %cst_69 = arith.constant dense<0.000000e+00> : vector<2x8x8xf32>
    %195 = tpu.matmul %192, %193, %cst_69 {dimension_numbers = #tpu.dot_dimension_numbers<[2], [2], [1], [1], [0, 0, 0, 1, 1, 1], [0], [0]>} : vector<2x8x16xf32>, vector<2x8x16xf32>, vector<2x8x8xf32> -> vector<2x8x8xf32>
    "tpu.trace_stop"() : () -> ()
    %196 = vector.broadcast %61 : vector<2x1x8xf32> to vector<2x8x8xf32>
    %197 = arith.addf %195, %196 : vector<2x8x8xf32>
    %cst_70 = arith.constant dense<0xFF800000> : vector<2x8xf32>
    %198 = vector.multi_reduction <maximumf>, %197, %cst_70 [2] : vector<2x8x8xf32> to vector<2x8xf32>
    %199 = vector.shape_cast %198 : vector<2x8xf32> to vector<2x8x1xf32>
    %200 = vector.broadcast %199 : vector<2x8x1xf32> to vector<2x8x8xf32>
    %201 = arith.subf %197, %200 : vector<2x8x8xf32>
    %202 = math.exp %201 : vector<2x8x8xf32>
    %cst_71 = arith.constant dense<0.000000e+00> : vector<2x8xf32>
    %203 = vector.multi_reduction <add>, %202, %cst_71 [2] : vector<2x8x8xf32> to vector<2x8xf32>
    %204 = vector.shape_cast %203 : vector<2x8xf32> to vector<2x8x1xf32>
    %205 = tpu.reciprocal %204 {approx = true} : vector<2x8x1xf32> -> vector<2x8x1xf32>
    %206 = vector.broadcast %205 : vector<2x8x1xf32> to vector<2x8x8xf32>
    %207 = arith.mulf %202, %206 : vector<2x8x8xf32>
    "tpu.trace_start"() <{level = 10 : i32, message = "bqk,bkd->bqd"}> : () -> ()
    %cst_72 = arith.constant dense<0.000000e+00> : vector<2x8x16xf32>
    %208 = tpu.matmul %207, %194, %cst_72 {dimension_numbers = #tpu.dot_dimension_numbers<[2], [1], [1], [2], [0, 0, 0, 1, 1, 2], [0], [0]>} : vector<2x8x8xf32>, vector<2x8x16xf32>, vector<2x8x16xf32> -> vector<2x8x16xf32>
    "tpu.trace_stop"() : () -> ()
    %209 = vector.shape_cast %208 : vector<2x8x16xf32> to vector<16x16xf32>
    %c48_73 = arith.constant 48 : index
    %c0_74 = arith.constant 0 : index
    %210 = vector.load %arg1[%c48_73, %c0_74] : memref<288x128xf32, #tpu.memory_space<vmem>>, vector<16x32xf32>
    %cst_75 = arith.constant dense<0.000000e+00> : vector<16x32xf32>
    %211 = tpu.matmul %209, %210, %cst_75 {dimension_numbers = #tpu.dot_dimension_numbers<[1], [0], [0], [1], [0, 0, 1, 1], [], []>} : vector<16x16xf32>, vector<16x32xf32>, vector<16x32xf32> -> vector<16x32xf32>
    %212 = vector.broadcast %191 : vector<1x32xf32> to vector<16x32xf32>
    %213 = arith.addf %212, %211 : vector<16x32xf32>
    %214 = vector.extract_strided_slice %190 {offsets = [0, 0, 16], sizes = [2, 8, 16], strides = [1, 1, 1]} : vector<2x8x96xf32> to vector<2x8x16xf32>
    %215 = vector.extract_strided_slice %190 {offsets = [0, 0, 48], sizes = [2, 8, 16], strides = [1, 1, 1]} : vector<2x8x96xf32> to vector<2x8x16xf32>
    %216 = vector.extract_strided_slice %190 {offsets = [0, 0, 80], sizes = [2, 8, 16], strides = [1, 1, 1]} : vector<2x8x96xf32> to vector<2x8x16xf32>
    "tpu.trace_start"() <{level = 10 : i32, message = "bqd,bkd->bqk"}> : () -> ()
    %cst_76 = arith.constant dense<0.000000e+00> : vector<2x8x8xf32>
    %217 = tpu.matmul %214, %215, %cst_76 {dimension_numbers = #tpu.dot_dimension_numbers<[2], [2], [1], [1], [0, 0, 0, 1, 1, 1], [0], [0]>} : vector<2x8x16xf32>, vector<2x8x16xf32>, vector<2x8x8xf32> -> vector<2x8x8xf32>
    "tpu.trace_stop"() : () -> ()
    %218 = vector.broadcast %61 : vector<2x1x8xf32> to vector<2x8x8xf32>
    %219 = arith.addf %217, %218 : vector<2x8x8xf32>
    %cst_77 = arith.constant dense<0xFF800000> : vector<2x8xf32>
    %220 = vector.multi_reduction <maximumf>, %219, %cst_77 [2] : vector<2x8x8xf32> to vector<2x8xf32>
    %221 = vector.shape_cast %220 : vector<2x8xf32> to vector<2x8x1xf32>
    %222 = vector.broadcast %221 : vector<2x8x1xf32> to vector<2x8x8xf32>
    %223 = arith.subf %219, %222 : vector<2x8x8xf32>
    %224 = math.exp %223 : vector<2x8x8xf32>
    %cst_78 = arith.constant dense<0.000000e+00> : vector<2x8xf32>
    %225 = vector.multi_reduction <add>, %224, %cst_78 [2] : vector<2x8x8xf32> to vector<2x8xf32>
    %226 = vector.shape_cast %225 : vector<2x8xf32> to vector<2x8x1xf32>
    %227 = tpu.reciprocal %226 {approx = true} : vector<2x8x1xf32> -> vector<2x8x1xf32>
    %228 = vector.broadcast %227 : vector<2x8x1xf32> to vector<2x8x8xf32>
    %229 = arith.mulf %224, %228 : vector<2x8x8xf32>
    "tpu.trace_start"() <{level = 10 : i32, message = "bqk,bkd->bqd"}> : () -> ()
    %cst_79 = arith.constant dense<0.000000e+00> : vector<2x8x16xf32>
    %230 = tpu.matmul %229, %216, %cst_79 {dimension_numbers = #tpu.dot_dimension_numbers<[2], [1], [1], [2], [0, 0, 0, 1, 1, 2], [0], [0]>} : vector<2x8x8xf32>, vector<2x8x16xf32>, vector<2x8x16xf32> -> vector<2x8x16xf32>
    "tpu.trace_stop"() : () -> ()
    %231 = vector.shape_cast %230 : vector<2x8x16xf32> to vector<16x16xf32>
    %c64_80 = arith.constant 64 : index
    %c0_81 = arith.constant 0 : index
    %232 = vector.load %arg1[%c64_80, %c0_81] : memref<288x128xf32, #tpu.memory_space<vmem>>, vector<16x32xf32>
    %cst_82 = arith.constant dense<0.000000e+00> : vector<16x32xf32>
    %233 = tpu.matmul %231, %232, %cst_82 {dimension_numbers = #tpu.dot_dimension_numbers<[1], [0], [0], [1], [0, 0, 1, 1], [], []>} : vector<16x16xf32>, vector<16x32xf32>, vector<16x32xf32> -> vector<16x32xf32>
    %234 = arith.addf %213, %233 : vector<16x32xf32>
    %235 = arith.addf %184, %234 : vector<16x32xf32>
    %c275_83 = arith.constant 275 : index
    %c0_84 = arith.constant 0 : index
    %236 = vector.load %arg1[%c275_83, %c0_84] : memref<288x128xf32, #tpu.memory_space<vmem>>, vector<1x32xf32>
    %c276_85 = arith.constant 276 : index
    %c0_86 = arith.constant 0 : index
    %237 = vector.load %arg1[%c276_85, %c0_86] : memref<288x128xf32, #tpu.memory_space<vmem>>, vector<1x32xf32>
    %cst_87 = arith.constant dense<0.000000e+00> : vector<16xf32>
    %238 = vector.multi_reduction <add>, %235, %cst_87 [1] : vector<16x32xf32> to vector<16xf32>
    %239 = vector.shape_cast %238 : vector<16xf32> to vector<16x1xf32>
    %cst_88 = arith.constant 3.200000e+01 : f32
    %240 = vector.broadcast %cst_88 : f32 to vector<16x1xf32>
    %241 = arith.divf %239, %240 : vector<16x1xf32>
    %242 = vector.broadcast %241 : vector<16x1xf32> to vector<16x32xf32>
    %243 = arith.subf %235, %242 : vector<16x32xf32>
    %244 = arith.mulf %243, %243 : vector<16x32xf32>
    %cst_89 = arith.constant dense<0.000000e+00> : vector<16xf32>
    %245 = vector.multi_reduction <add>, %244, %cst_89 [1] : vector<16x32xf32> to vector<16xf32>
    %246 = vector.shape_cast %245 : vector<16xf32> to vector<16x1xf32>
    %cst_90 = arith.constant 3.200000e+01 : f32
    %247 = vector.broadcast %cst_90 : f32 to vector<16x1xf32>
    %248 = arith.divf %246, %247 : vector<16x1xf32>
    %249 = vector.broadcast %241 : vector<16x1xf32> to vector<16x32xf32>
    %250 = arith.subf %235, %249 : vector<16x32xf32>
    %cst_91 = arith.constant 9.99999996E-13 : f32
    %251 = vector.broadcast %cst_91 : f32 to vector<16x1xf32>
    %252 = arith.addf %248, %251 : vector<16x1xf32>
    %253 = math.rsqrt %252 : vector<16x1xf32>
    %254 = vector.broadcast %253 : vector<16x1xf32> to vector<16x32xf32>
    %255 = arith.mulf %250, %254 : vector<16x32xf32>
    %256 = vector.broadcast %236 : vector<1x32xf32> to vector<16x32xf32>
    %257 = arith.mulf %255, %256 : vector<16x32xf32>
    %258 = vector.broadcast %237 : vector<1x32xf32> to vector<16x32xf32>
    %259 = arith.addf %257, %258 : vector<16x32xf32>
    %c80_92 = arith.constant 80 : index
    %c0_93 = arith.constant 0 : index
    %260 = vector.load %arg1[%c80_92, %c0_93] : memref<288x128xf32, #tpu.memory_space<vmem>>, vector<32x64xf32>
    %cst_94 = arith.constant dense<0.000000e+00> : vector<16x64xf32>
    %261 = tpu.matmul %259, %260, %cst_94 {dimension_numbers = #tpu.dot_dimension_numbers<[1], [0], [0], [1], [0, 0, 1, 1], [], []>} : vector<16x32xf32>, vector<32x64xf32>, vector<16x64xf32> -> vector<16x64xf32>
    %c277_95 = arith.constant 277 : index
    %c0_96 = arith.constant 0 : index
    %262 = vector.load %arg1[%c277_95, %c0_96] : memref<288x128xf32, #tpu.memory_space<vmem>>, vector<1x64xf32>
    %263 = vector.broadcast %262 : vector<1x64xf32> to vector<16x64xf32>
    %264 = arith.addf %261, %263 : vector<16x64xf32>
    %cst_97 = arith.constant 5.000000e-01 : f32
    %265 = vector.broadcast %cst_97 : f32 to vector<16x64xf32>
    %266 = arith.mulf %265, %264 : vector<16x64xf32>
    %cst_98 = arith.constant 4.471500e-02 : f32
    %267 = vector.broadcast %cst_98 : f32 to vector<16x64xf32>
    %268 = arith.mulf %267, %264 : vector<16x64xf32>
    %269 = arith.mulf %268, %264 : vector<16x64xf32>
    %270 = arith.mulf %269, %264 : vector<16x64xf32>
    %271 = arith.addf %264, %270 : vector<16x64xf32>
    %cst_99 = arith.constant 0.797884583 : f32
    %272 = vector.broadcast %cst_99 : f32 to vector<16x64xf32>
    %273 = arith.mulf %272, %271 : vector<16x64xf32>
    %274 = math.tanh %273 : vector<16x64xf32>
    %cst_100 = arith.constant 1.000000e+00 : f32
    %275 = vector.broadcast %cst_100 : f32 to vector<16x64xf32>
    %276 = arith.addf %275, %274 : vector<16x64xf32>
    %277 = arith.mulf %266, %276 : vector<16x64xf32>
    %c112_101 = arith.constant 112 : index
    %c0_102 = arith.constant 0 : index
    %278 = vector.load %arg1[%c112_101, %c0_102] : memref<288x128xf32, #tpu.memory_space<vmem>>, vector<64x32xf32>
    %cst_103 = arith.constant dense<0.000000e+00> : vector<16x32xf32>
    %279 = tpu.matmul %277, %278, %cst_103 {dimension_numbers = #tpu.dot_dimension_numbers<[1], [0], [0], [1], [0, 0, 1, 1], [], []>} : vector<16x64xf32>, vector<64x32xf32>, vector<16x32xf32> -> vector<16x32xf32>
    %c278_104 = arith.constant 278 : index
    %c0_105 = arith.constant 0 : index
    %280 = vector.load %arg1[%c278_104, %c0_105] : memref<288x128xf32, #tpu.memory_space<vmem>>, vector<1x32xf32>
    %281 = vector.broadcast %280 : vector<1x32xf32> to vector<16x32xf32>
    %282 = arith.addf %279, %281 : vector<16x32xf32>
    %283 = arith.addf %259, %282 : vector<16x32xf32>
    %c279_106 = arith.constant 279 : index
    %c0_107 = arith.constant 0 : index
    %284 = vector.load %arg1[%c279_106, %c0_107] : memref<288x128xf32, #tpu.memory_space<vmem>>, vector<1x32xf32>
    %c280_108 = arith.constant 280 : index
    %c0_109 = arith.constant 0 : index
    %285 = vector.load %arg1[%c280_108, %c0_109] : memref<288x128xf32, #tpu.memory_space<vmem>>, vector<1x32xf32>
    %cst_110 = arith.constant dense<0.000000e+00> : vector<16xf32>
    %286 = vector.multi_reduction <add>, %283, %cst_110 [1] : vector<16x32xf32> to vector<16xf32>
    %287 = vector.shape_cast %286 : vector<16xf32> to vector<16x1xf32>
    %cst_111 = arith.constant 3.200000e+01 : f32
    %288 = vector.broadcast %cst_111 : f32 to vector<16x1xf32>
    %289 = arith.divf %287, %288 : vector<16x1xf32>
    %290 = vector.broadcast %289 : vector<16x1xf32> to vector<16x32xf32>
    %291 = arith.subf %283, %290 : vector<16x32xf32>
    %292 = arith.mulf %291, %291 : vector<16x32xf32>
    %cst_112 = arith.constant dense<0.000000e+00> : vector<16xf32>
    %293 = vector.multi_reduction <add>, %292, %cst_112 [1] : vector<16x32xf32> to vector<16xf32>
    %294 = vector.shape_cast %293 : vector<16xf32> to vector<16x1xf32>
    %cst_113 = arith.constant 3.200000e+01 : f32
    %295 = vector.broadcast %cst_113 : f32 to vector<16x1xf32>
    %296 = arith.divf %294, %295 : vector<16x1xf32>
    %297 = vector.broadcast %289 : vector<16x1xf32> to vector<16x32xf32>
    %298 = arith.subf %283, %297 : vector<16x32xf32>
    %cst_114 = arith.constant 9.99999996E-13 : f32
    %299 = vector.broadcast %cst_114 : f32 to vector<16x1xf32>
    %300 = arith.addf %296, %299 : vector<16x1xf32>
    %301 = math.rsqrt %300 : vector<16x1xf32>
    %302 = vector.broadcast %301 : vector<16x1xf32> to vector<16x32xf32>
    %303 = arith.mulf %298, %302 : vector<16x32xf32>
    %304 = vector.broadcast %284 : vector<1x32xf32> to vector<16x32xf32>
    %305 = arith.mulf %303, %304 : vector<16x32xf32>
    %306 = vector.broadcast %285 : vector<1x32xf32> to vector<16x32xf32>
    %307 = arith.addf %305, %306 : vector<16x32xf32>
    %308 = tpu.iota {dimensions = array<i32: 1>} : vector<8x16xi32>
    %309 = tpu.iota {dimensions = array<i32: 0>} : vector<8x16xi32>
    %c8_i32 = arith.constant 8 : i32
    %310 = vector.broadcast %c8_i32 : i32 to vector<8x16xi32>
    %311 = arith.muli %309, %310 : vector<8x16xi32>
    %312 = arith.cmpi eq, %308, %311 : vector<8x16xi32>
    %313 = arith.extui %312 : vector<8x16xi1> to vector<8x16xi32>
    %314 = arith.sitofp %313 : vector<8x16xi32> to vector<8x16xf32>
    %cst_115 = arith.constant dense<0.000000e+00> : vector<8x32xf32>
    %315 = tpu.matmul %314, %307, %cst_115 {dimension_numbers = #tpu.dot_dimension_numbers<[1], [0], [0], [1], [0, 0, 1, 1], [], []>} : vector<8x16xf32>, vector<16x32xf32>, vector<8x32xf32> -> vector<8x32xf32>
    %c176_116 = arith.constant 176 : index
    %c0_117 = arith.constant 0 : index
    %316 = vector.load %arg1[%c176_116, %c0_117] : memref<288x128xf32, #tpu.memory_space<vmem>>, vector<32x32xf32>
    %cst_118 = arith.constant dense<0.000000e+00> : vector<8x32xf32>
    %317 = tpu.matmul %315, %316, %cst_118 {dimension_numbers = #tpu.dot_dimension_numbers<[1], [0], [0], [1], [0, 0, 1, 1], [], []>} : vector<8x32xf32>, vector<32x32xf32>, vector<8x32xf32> -> vector<8x32xf32>
    %c281 = arith.constant 281 : index
    %c0_119 = arith.constant 0 : index
    %318 = vector.load %arg1[%c281, %c0_119] : memref<288x128xf32, #tpu.memory_space<vmem>>, vector<1x32xf32>
    %319 = vector.broadcast %318 : vector<1x32xf32> to vector<8x32xf32>
    %320 = arith.addf %317, %319 : vector<8x32xf32>
    %321 = math.tanh %320 : vector<8x32xf32>
    %c208 = arith.constant 208 : index
    %c0_120 = arith.constant 0 : index
    %322 = vector.load %arg1[%c208, %c0_120] : memref<288x128xf32, #tpu.memory_space<vmem>>, vector<32x128xf32>
    %cst_121 = arith.constant dense<0.000000e+00> : vector<8x128xf32>
    %323 = tpu.matmul %321, %322, %cst_121 {dimension_numbers = #tpu.dot_dimension_numbers<[1], [0], [0], [1], [0, 0, 1, 1], [], []>} : vector<8x32xf32>, vector<32x128xf32>, vector<8x128xf32> -> vector<8x128xf32>
    %c282 = arith.constant 282 : index
    %c0_122 = arith.constant 0 : index
    %324 = vector.load %arg1[%c282, %c0_122] : memref<288x128xf32, #tpu.memory_space<vmem>>, vector<1x128xf32>
    %325 = vector.broadcast %324 : vector<1x128xf32> to vector<8x128xf32>
    %326 = arith.addf %323, %325 : vector<8x128xf32>
    %c240 = arith.constant 240 : index
    %c0_123 = arith.constant 0 : index
    %327 = vector.load %arg1[%c240, %c0_123] : memref<288x128xf32, #tpu.memory_space<vmem>>, vector<32x128xf32>
    %cst_124 = arith.constant dense<0.000000e+00> : vector<16x128xf32>
    %328 = tpu.matmul %307, %327, %cst_124 {dimension_numbers = #tpu.dot_dimension_numbers<[1], [0], [0], [1], [0, 0, 1, 1], [], []>} : vector<16x32xf32>, vector<32x128xf32>, vector<16x128xf32> -> vector<16x128xf32>
    %c283 = arith.constant 283 : index
    %c0_125 = arith.constant 0 : index
    %329 = vector.load %arg1[%c283, %c0_125] : memref<288x128xf32, #tpu.memory_space<vmem>>, vector<1x128xf32>
    %330 = vector.broadcast %329 : vector<1x128xf32> to vector<16x128xf32>
    %331 = arith.addf %328, %330 : vector<16x128xf32>
    %c0_126 = arith.constant 0 : index
    %c0_127 = arith.constant 0 : index
    %332 = vector.load %arg4[%c0_126, %c0_127] : memref<8x128xf32, #tpu.memory_space<vmem>>, vector<8x128xf32>
    tpu.vector_store %arg4[%c0_126, %c0_127], %326 {strides = array<i32>} : memref<8x128xf32, #tpu.memory_space<vmem>>, vector<8x128xf32>,
    %c0_128 = arith.constant 0 : index
    %c0_129 = arith.constant 0 : index
    %333 = vector.load %arg5[%c0_128, %c0_129] : memref<16x128xf32, #tpu.memory_space<vmem>>, vector<16x128xf32>
    tpu.vector_store %arg5[%c0_128, %c0_129], %331 {strides = array<i32>} : memref<16x128xf32, #tpu.memory_space<vmem>>, vector<16x128xf32>,
    return
  }
}

</mosaic_0001>

<bundles_post_ra>
// kernel: _forward_logits.1
= control target key start
LH: loop header
LB: loop body
LE: loop exit
PB: predicated region body
PF: predicated region fallthrough
CT: control target
= control target key end

     0   :  { %11 = vsyncpa [#allocation3], 0  ;;  %s1752_s21 = smov [#allocation2]   ;;  %s1753_s23 = smov 128   ;;  %s2188_s0 = inlined_call_operand.vmem [shape: f32[184,16], index: 0, kind: input, shape index: {}]   ;;  %s2189_s1 = inlined_call_operand.hbm [shape: f32[288,128], index: 1, kind: input, shape index: {}]   ;;  %s2190_s2 = inlined_call_operand.vmem [shape: s32[16,2], index: 2, kind: input, shape index: {}]   ;;  %s2191_s3 = inlined_call_operand.vmem [shape: f32[2,8], index: 3, kind: input, shape index: {}]   ;;  %s2192_s4 = inlined_call_operand.vmem [shape: f32[8,128], index: 4, kind: output, shape index: {0}]   ;;  %s2193_s5 = inlined_call_operand.vmem [shape: f32[16,128], index: 5, kind: output, shape index: {1}]  }
   0x1   :  { %s18_s20 = sshll.u32 %s2189_s1, 4  ;;  %s20_s22 = sshll.u32 %s1752_s21, 4  ;;  %s19_s20 = int_to_ptr.hbm [resolvable:$true] %s18_s20  ;;  %s21_s22 = int_to_ptr.vmem [resolvable:$true] %s20_s22 }
   0x2   :  { %s1754_s24 = smov 8  }
   0x3   :  { %26 = dma.hbm_to_vmem [thread:$0]  %s19_s20, 4608, %s21_s22, [#allocation3], %s1753_s23, %s1753_s23, %s1754_s24  }
   0x4   :  { %1750 = dma.done.wait [#allocation3], 4608  }
   0x5   :  { %1751 = vsyncadd [#allocation3], 4294962688  ;;  %v1755_v0 = vmov 1   ;;  %v1756_v1 = vmov 0   ;;  %vm124_vm0 = vcmask 1041408   ;;  %v35_v2 = vld [vmem:[%s2190_s2] sm:$0xff]  ;;  %v37_v21 = vlaneseq }
   0x6   :  { %1631 = vset.pattern.permute.xlu0 %v1755_v0  ;;  %1632 = vset.pattern.permute.xlu1 %v1756_v1  ;;  %v116_v3 = vld [vmem:[%s2188_s0 + $0xa8] sm:$0x3]  ;;  %vm158_vm1 = vcmask 1043456   ;;  %v63_v4 = vld [vmem:[%s2188_s0 + $0x60] sm:$0xf]  ;;  %v62_v5 = vld [vmem:[%s2188_s0 + $0x58] sm:$0xff] }
   0x7   :  { %105 = vperm.xlu0 %1631, %v35_v2   ;;  %40 = vperm.xlu1 %1632, %v35_v2   ;;  %v61_v6 = vld [vmem:[%s2188_s0 + $0x50] sm:$0xff]  ;;  %v36_v7 = vld [vmem:[%s2190_s2 + $0x8] sm:$0xff]  ;;  %v59_v9 = vld [vmem:[%s2188_s0 + $0x40] sm:$0xff]  ;;  %v1861_v24 = vand.u32 127, %v37_v21  ;;  %v1869_v27 = vshrl.u32 %v37_v21, 7  ;;  %v1757_v29 = vmov 0.0  }
   0x8   :  { %1560 = vmatpush.msk.msra.mxu2 %vm124_vm0, %v116_v3  ;;  %v60_v8 = vld [vmem:[%s2188_s0 + $0x48] sm:$0xff]  ;;  %v58_v10 = vld [vmem:[%s2188_s0 + $0x38] sm:$0xff]  ;;  %v57_v11 = vld [vmem:[%s2188_s0 + $0x30] sm:$0xff]  ;;  %vm77_vm3 = vcmask 523264   ;;  %vm117_vm4 = vcmask 15360   ;;  %vm151_vm8 = vcmask 818176  }
   0x9   :  { %v56_v12 = vld [vmem:[%s2188_s0 + $0x28] sm:$0xff]  ;;  %v76_v13 = vld [vmem:[%s2188_s0 + $0xa0] sm:$0xff]  ;;  %v75_v15 = vld [vmem:[%s2188_s0 + $0x98] sm:$0xff]  ;;  %vm66_vm2 = vcmp.eq.s32.totalorder %v1861_v24, %v1869_v27  ;;  %vm189_vm10 = vcmask 130048   ;;  %v1758_v51 = vmov 16.0   ;;  %s1760_s23 = smov 80  }
   0xa   :  { %1563 = vmatpush.msk.msrb.mxu2 %vm158_vm1, %v63_v4  ;;  %v55_v14 = vld [vmem:[%s2188_s0 + $0x20] sm:$0xff]  ;;  %89 = vmatpush.msra.mxu0 %v76_v13  ;;  %v54_v16 = vld [vmem:[%s2188_s0 + $0x18] sm:$0xff]  ;;  %v74_v17 = vld [vmem:[%s2188_s0 + $0x90] sm:$0xff]  ;;  %v1555_v30 = vsel %vm66_vm2, 1.0, %v1757_v29  ;;  %1660 = vrcp.f32 %v1758_v51  ;;  %vm291_vm2 = vcmask 261120   ;;  %s1761_s24 = smov 112  }
   0xb   :  { %v53_v18 = vld [vmem:[%s2188_s0 + $0x10] sm:$0xff]  ;;  %v73_v19 = vld [vmem:[%s2188_s0 + $0x88] sm:$0xff]  ;;  %v72_v22 = vld [vmem:[%s2188_s0 + $0x80] sm:$0xff]  ;;  %s1763_s27 = smov 48  }
   0xc   :  { %166 = vmatpush.msrb.mxu2 %v62_v5  ;;  %90 = vmatpush.msra.mxu0 %v75_v15  ;;  %v52_v20 = vld [vmem:[%s2188_s0 + $0x8] sm:$0xff]  ;;  %v51_v23 = vld [vmem:[%s2188_s0] sm:$0xff]  ;;  %v71_v25 = vld [vmem:[%s2188_s0 + $0x78] sm:$0xff] }
   0xd   :  { %v70_v26 = vld [vmem:[%s2188_s0 + $0x70] sm:$0xff]  ;;  %v69_v28 = vld [vmem:[%s2188_s0 + $0x68] sm:$0xff]  ;;  %v247_v5 = vld [vmem:[#allocation2] sm:$0xff] }
   0xe   :  { %167 = vmatpush.msrb.mxu2 %v61_v6  ;;  %91 = vmatpush.msra.mxu0 %v74_v17  ;;  %v248_v4 = vld [vmem:[#allocation2 + $0x8] sm:$0xff] }
   0xf   :  { %108 = vperm.xlu0 %1631, %v36_v7   ;;  %43 = vperm.xlu1 %1632, %v36_v7  }
  0x10   :  { %168 = vmatpush.msrb.mxu2 %v60_v8  ;;  %92 = vmatpush.msra.mxu0 %v73_v19  ;;  %v1661_v52 = vpop.eup %1660 }
  0x11   :  { %v197_v53 = vmul.f32 16.0, %v1661_v52  ;;  %vm201_vm11 = vweird.f32 %v1661_v52  ;;  %271 = vmatpush.msra.mxu3 %v248_v4 }
  0x12   :  { %169 = vmatpush.msrb.mxu2 %v59_v9  ;;  %93 = vmatpush.msra.mxu0 %v72_v22  ;;  %v1891_v9 = vld [vmem:[#allocation2 + $0x28] sm:$0xff]  ;;  %v1638_v22 = vld [vmem:[%s2188_s0 + $0xb0] ss:$0 sm:$0xff] }
  0x13   :  { %v198_v54 = vsub.f32 1.0, %v197_v53  ;;  %272 = vmatpush.msra.mxu3 %v247_v5  ;;  %310 = vmatpush.msra.mxu1 %v1891_v9 }
  0x14   :  { %170 = vmatpush.msrb.mxu2 %v58_v10  ;;  %94 = vmatpush.msra.mxu0 %v71_v25  ;;  %v1893_v10 = vld [vmem:[#allocation2 + $0x20] sm:$0xff] }
  0x15   :  { %v199_v55 = vmul.f32 %v1661_v52, %v198_v54  ;;  %311 = vmatpush.msra.mxu1 %v1893_v10 }
  0x16   :  { %171 = vmatpush.msrb.mxu2 %v57_v11  ;;  %95 = vmatpush.msra.mxu0 %v70_v26 }
  0x17   :  { %v200_v56 = vadd.f32 %v1661_v52, %v199_v55  ;;  %v280_v55 = vld [vmem:[%s2191_s3] sm:$0x3]  ;;  %s1762_s3 = smov 64  }
  0x18   :  { %172 = vmatpush.msrb.mxu2 %v56_v12  ;;  %96 = vmatpush.msra.mxu0 %v69_v28  ;;  %v1639_v28 = vld [vmem:[%s2188_s0 + $0xb1] ss:$0 sm:$0xff]  ;;  %s1759_s0 = smov 96  }
  0x19   :  { %1556 = vmatmul.msk.f32.vlgmr.msra.gmra.mxu0 %vm77_vm3, %v1555_v30  ;;  %v202_v57 = vsel %vm201_vm11, %v1661_v52, %v200_v56  ;;  %v281_v56 = vsub.f32 1.0, %v280_v55 }
  0x1a   :  { %173 = vmatpush.msrb.mxu2 %v55_v14 }
  0x1c   :  { %174 = vmatpush.msrb.mxu2 %v54_v16 }
  0x1e   :  { %175 = vmatpush.msrb.mxu2 %v53_v18 }
  0x20   :  { %176 = vmatpush.msrb.mxu2 %v52_v20 }
  0x21   :  { %1557 = vmatmul.msk.f32.gmra.mxu0 %vm77_vm3, %v1555_v30 }
  0x22   :  { %177 = vmatpush.msrb.mxu2 %v51_v23 }
  0x79   :  { %v106_v31 = vpop.permute.xlu0 %105  ;;  %v41_v34 = vpop.permute.xlu1 %40 }
  0x7a   :  { %vm110_vm5 = vcmp.eq.s32.totalorder %v1861_v24, %v106_v31  ;;  %vm45_vm7 = vcmp.eq.s32.totalorder %v1861_v24, %v41_v34 }
  0x7b   :  { %v1558_v32 = vsel %vm110_vm5, 1.0, %v1757_v29  ;;  %v1553_v36 = vsel %vm45_vm7, 1.0, %v1757_v29 }
  0x7c   :  { %1561 = vmatmul.msk.f32.vlgmr.msra.gmra.mxu2 %vm117_vm4, %v1558_v32 }
  0x81   :  { %v109_v33 = vpop.permute.xlu0 %108  ;;  %v44_v37 = vpop.permute.xlu1 %43 }
  0x82   :  { %vm111_vm6 = vcmp.eq.s32.totalorder %v1861_v24, %v109_v33  ;;  %vm46_vm9 = vcmp.eq.s32.totalorder %v1861_v24, %v44_v37 }
  0x83   :  { %v1559_v35 = vsel %vm111_vm6, 1.0, %v1757_v29  ;;  %v1554_v38 = vsel %vm46_vm9, 1.0, %v1757_v29 }
  0x84   :  { %1562 = vmatmul.msk.f32.gmra.mxu2 %vm117_vm4, %v1559_v35  ;;  %vm380_vm4 = vcmask 64512  }
  0x8c   :  { %1564 = vmatmul.msk.f32.vlgmr.msrb.gmra.mxu2 %vm151_vm8, %v1553_v36 }
  0x94   :  { %1565 = vmatmul.msk.f32.gmra.mxu2 %vm151_vm8, %v1554_v38 }
  0x96   :  { %v98_v41 = vpop.f32.mrf.mxu0 }
  0x9e   :  { %v101_v46 = vpop.f32.mrf.mxu0 }
  0xff   :  { %v145_v39 = vpop.f32.mrf.mxu2 }
 0x107   :  { %v148_v40 = vpop.f32.mrf.mxu2 }
 0x10f   :  { %v179_v42 = vpop.f32.mrf.mxu2 }
 0x110   :  { %v180_v43 = vadd.f32 %v179_v42, %v98_v41  ;;  %v1640_v41 = vld [vmem:[#allocation2 + $0x110] ss:$0 sm:$0xff] }
 0x112   :  { %v185_v44 = vadd.f32 %v180_v43, %v145_v39  ;;  %v1905_v39 = vld [vmem:[#allocation2 + $0x18] sm:$0xff] }
 0x113   :  { %312 = vmatpush.msra.mxu1 %v1905_v39 }
 0x114   :  { %v190_v45 = vsel %vm189_vm10, %v185_v44, 0.0 }
 0x115   :  { %191 = vadd.xlane.f32.xlu2 %v190_v45 }
 0x117   :  { %v182_v47 = vpop.f32.mrf.mxu2 }
 0x118   :  { %v183_v48 = vadd.f32 %v182_v47, %v101_v46  ;;  %v1641_v46 = vld [vmem:[#allocation2 + $0x111] ss:$0 sm:$0xff] }
 0x11a   :  { %v186_v49 = vadd.f32 %v183_v48, %v148_v40  ;;  %v1908_v40 = vld [vmem:[#allocation2 + $0x10] sm:$0xff] }
 0x11b   :  { %313 = vmatpush.msra.mxu1 %v1908_v40 }
 0x11c   :  { %v193_v50 = vsel %vm189_vm10, %v186_v49, 0.0 }
 0x11d   :  { %194 = vadd.xlane.f32.xlu2 %v193_v50 }
 0x188   :  { %v192_v58 = vpop.xlane.xlu2 %191 }
 0x189   :  { %v203_v59 = vmul.f32 %v202_v57, %v192_v58 }
 0x18b   :  { %v205_v60 = vsub.f32 %v185_v44, %v203_v59 }
 0x18d   :  { %v207_v61 = vmul.f32 %v205_v60, %v205_v60 }
 0x18f   :  { %v209_v62 = vsel %vm189_vm10, %v207_v61, 0.0 }
 0x190   :  { %210 = vadd.xlane.f32.xlu0 %v209_v62  ;;  %v195_v63 = vpop.xlane.xlu2 %194 }
 0x191   :  { %v204_v0 = vmul.f32 %v202_v57, %v195_v63 }
 0x193   :  { %v206_v1 = vsub.f32 %v186_v49, %v204_v0 }
 0x195   :  { %v208_v2 = vmul.f32 %v206_v1, %v206_v1 }
 0x197   :  { %v212_v3 = vsel %vm189_vm10, %v208_v2, 0.0 }
 0x198   :  { %213 = vadd.xlane.f32.xlu1 %v212_v3 }
 0x203   :  { %v211_v6 = vpop.xlane.xlu0 %210 }
 0x204   :  { %v215_v7 = vmul.f32 %v211_v6, %v202_v57 }
 0x206   :  { %v217_v8 = vadd.f32 1e-12, %v215_v7 }
 0x208   :  { %1662 = vrsqrt.f32 %v217_v8  ;;  %vm225_vm13 = vweird.f32 %v217_v8 }
 0x20b   :  { %v214_v11 = vpop.xlane.xlu1 %213 }
 0x20c   :  { %v216_v12 = vmul.f32 %v214_v11, %v202_v57  ;;  %v282_v57 = vmul.f32 -1e+09, %v281_v56 }
 0x20e   :  { %v1663_v13 = vpop.eup %1662  ;;  %v218_v14 = vadd.f32 1e-12, %v216_v12  ;;  %v1942_v58 = vperm.slane %v282_v57, 0  ;;  %v284_v61 = vrot.slane %v282_v57, 1 }
 0x20f   :  { %v220_v15 = vmul.f32 %v1663_v13, %v217_v8  ;;  %vm226_vm12 = vweird.f32 %v1663_v13 }
 0x210   :  { %1664 = vrsqrt.f32 %v218_v14  ;;  %vm227_vm14 = vmor %vm225_vm13, %vm226_vm12  ;;  %vm235_vm0 = vweird.f32 %v218_v14  ;;  %v1946_v63 = vperm.slane %v284_v61, 0 }
 0x211   :  { %v221_v16 = vmul.f32 %v1663_v13, %v220_v15 }
 0x213   :  { %v222_v17 = vmul.f32 0.5, %v221_v16 }
 0x215   :  { %v223_v18 = vsub.f32 1.5, %v222_v17 }
 0x216   :  { %v1665_v19 = vpop.eup %1664 }
 0x217   :  { %v224_v20 = vmul.f32 %v1663_v13, %v223_v18  ;;  %v230_v21 = vmul.f32 %v1665_v19, %v218_v14  ;;  %vm236_vm15 = vweird.f32 %v1665_v19 }
 0x218   :  { %vm237_vm1 = vmor %vm235_vm0, %vm236_vm15 }
 0x219   :  { %v228_v23 = vsel %vm227_vm14, %v1663_v13, %v224_v20  ;;  %v231_v25 = vmul.f32 %v1665_v19, %v230_v21 }
 0x21a   :  { %v239_v26 = vmul.f32 %v228_v23, %v205_v60 }
 0x21b   :  { %v232_v30 = vmul.f32 0.5, %v231_v25 }
 0x21c   :  { %v242_v31 = vmul.f32 %v1638_v22, %v239_v26 }
 0x21d   :  { %v233_v32 = vsub.f32 1.5, %v232_v30 }
 0x21e   :  { %v245_v33 = vadd.f32 %v1639_v28, %v242_v31 }
 0x21f   :  { %v234_v34 = vmul.f32 %v1665_v19, %v233_v32 }
 0x220   :  { %1566 = vmatmul.msk.f32.vlgmr.msra.gmra.mxu3 %vm189_vm10, %v245_v33 }
 0x221   :  { %v238_v35 = vsel %vm237_vm1, %v1665_v19, %v234_v34  ;;  %v1973_v34 = vld [vmem:[#allocation2 + $0x38] sm:$0xff] }
 0x222   :  { %v240_v36 = vmul.f32 %v238_v35, %v206_v1 }
 0x224   :  { %v243_v37 = vmul.f32 %v1638_v22, %v240_v36 }
 0x226   :  { %v246_v38 = vadd.f32 %v1639_v28, %v243_v37 }
 0x228   :  { %1567 = vmatmul.msk.f32.gmra.mxu3 %vm189_vm10, %v246_v38 }
 0x2a3   :  { %v274_v42 = vpop.f32.mrf.mxu3 }
 0x2a4   :  { %v1911_v43 = vadd.f32 %v1640_v41, %v274_v42  ;;  %v1985_v42 = vld [vmem:[#allocation2 + $0x40] sm:$0xff] }
 0x2a6   :  { %1568 = vmatmul.msk.f32.vlgmr.msra.gmra.mxu1 %vm291_vm2, %v1911_v43 }
 0x2ab   :  { %v277_v44 = vpop.f32.mrf.mxu3 }
 0x2ac   :  { %v1915_v45 = vadd.f32 %v1640_v41, %v277_v44  ;;  %v1982_v41 = vld [vmem:[#allocation2 + $0x48] sm:$0xff] }
 0x2ae   :  { %1569 = vmatmul.msk.f32.gmra.mxu1 %vm291_vm2, %v1915_v45 }
 0x323   :  { %v315_v47 = vpop.f32.mrf.mxu1 }
 0x324   :  { %v1919_v48 = vadd.f32 %v1641_v46, %v315_v47 }
 0x326   :  { %327 = vrot.lane.b32.xlu2 %v1919_v48, %s1759_s0 }
 0x32b   :  { %v318_v49 = vpop.f32.mrf.mxu1 }
 0x32c   :  { %v1923_v50 = vadd.f32 %v1641_v46, %v318_v49 }
 0x32e   :  { %354 = vrot.lane.b32.xlu2 %v1923_v50, %s1759_s0 }
 0x336   :  { %491 = vrot.lane.b32.xlu2 %v1919_v48, %s1760_s23 }
 0x33e   :  { %489 = vrot.lane.b32.xlu2 %v1919_v48, %s1761_s24 }
 0x380   :  { %v328_v51 = vpop.permute.xlu2 %327 }
 0x381   :  { %1570 = vmatpush.xpose.msk.msrb.mxu3 %vm189_vm10, %v328_v51  ;;  %v1993_v51 = vld [vmem:[#allocation2 + $0x112] ss:$0 sm:$0xff] }
 0x384   :  { %1571 = vmatmul.msk.f32.vlgmr.msrb.gmra.mxu3 %vm189_vm10, %v1919_v48 }
 0x388   :  { %v355_v52 = vpop.permute.xlu2 %354 }
 0x389   :  { %1572 = vmatpush.xpose.msk.msra.mxu3 %vm189_vm10, %v355_v52 }
 0x38c   :  { %1573 = vmatmul.msk.f32.vlgmr.msra.gmra.mxu3 %vm189_vm10, %v1923_v50 }
 0x38d   :  { %477 = vmatpush.msrb.mxu3 %v1973_v34 }
 0x390   :  { %v492_v53 = vpop.permute.xlu2 %491 }
 0x391   :  { %1578 = vmatpush.xpose.msk.msrb.mxu0 %vm189_vm10, %v492_v53 }
 0x398   :  { %v490_v54 = vpop.permute.xlu2 %489 }
 0x399   :  { %1579 = vmatmul.msk.f32.vlgmr.msrb.gmra.mxu0 %vm189_vm10, %v490_v54 }
 0x407   :  { %v350_v59 = vpop.f32.mrf.mxu3 }
 0x408   :  { %v351_v60 = vadd.f32 %v350_v59, %v1942_v58 }
 0x40a   :  { %v381_v62 = vsel %vm380_vm4, %v351_v60, -inf }
 0x40b   :  { %382 = vmax.xlane.f32.xlu0 %v381_v62 }
 0x40f   :  { %v377_v0 = vpop.f32.mrf.mxu3 }
 0x410   :  { %v378_v1 = vadd.f32 %v377_v0, %v1946_v63 }
 0x412   :  { %v384_v2 = vsel %vm380_vm4, %v378_v1, -inf }
 0x413   :  { %385 = vmax.xlane.f32.xlu1 %v384_v2 }
 0x416   :  { %v514_v3 = vpop.f32.mrf.mxu0 }
 0x417   :  { %v515_v4 = vadd.f32 %v514_v3, %v1942_v58 }
 0x419   :  { %v545_v5 = vsel %vm380_vm4, %v515_v4, -inf }
 0x41a   :  { %546 = vmax.xlane.f32.xlu2 %v545_v5 }
 0x41f   :  { %403 = vrot.lane.b32.xlu0 %v1919_v48, %s1762_s3 }
 0x432   :  { %517 = vrot.lane.b32.xlu2 %v1923_v50, %s1761_s24 }
 0x43a   :  { %593 = vrot.lane.b32.xlu2 %v1923_v50, %s1763_s27 }
 0x47e   :  { %v383_v6 = vpop.xlane.xlu0 %382 }
 0x47f   :  { %v387_v7 = vsub.f32 %v351_v60, %v383_v6 }
 0x481   :  { %v389_v8 = vmul.f32 1.442695, %v387_v7 }
 0x483   :  { %1666 = vpow2.f32 %v389_v8 }
 0x486   :  { %v386_v13 = vpop.xlane.xlu1 %385 }
 0x487   :  { %v388_v16 = vsub.f32 %v378_v1, %v386_v13  ;;  %v1764_v1 = vmov 32.0  }
 0x489   :  { %v1667_v11 = vpop.eup %1666  ;;  %v391_v19 = vmul.f32 1.442695, %v388_v16 }
 0x48a   :  { %v393_v12 = vsel %vm380_vm4, %v1667_v11, 0.0 }
 0x48b   :  { %394 = vadd.xlane.f32.xlu0 %v393_v12 }
 0x48d   :  { %v547_v14 = vpop.xlane.xlu2 %546 }
 0x48e   :  { %v551_v15 = vsub.f32 %v515_v4, %v547_v14 }
 0x490   :  { %v553_v17 = vmul.f32 1.442695, %v551_v15 }
 0x491   :  { %v404_v18 = vpop.permute.xlu0 %403 }
 0x492   :  { %1668 = vpow2.f32 %v553_v17  ;;  %424 = vmatpush.msrb.mxu1 %v404_v18  ;;  %v2004_v17 = vld [vmem:[#allocation2 + $0x68] sm:$0xff]  ;;  %v2007_v18 = vld [vmem:[#allocation2 + $0x60] sm:$0xff] }
 0x493   :  { %1670 = vpow2.f32 %v391_v19  ;;  %v2010_v19 = vld [vmem:[#allocation2 + $0x58] sm:$0xff] }
 0x495   :  { %v518_v20 = vpop.permute.xlu2 %517 }
 0x498   :  { %v1669_v21 = vpop.eup %1668 }
 0x499   :  { %v557_v22 = vsel %vm380_vm4, %v1669_v21, 0.0  ;;  %v1671_v25 = vpop.eup %1670 }
 0x49a   :  { %558 = vadd.xlane.f32.xlu1 %v557_v22  ;;  %v396_v26 = vsel %vm380_vm4, %v1671_v25, 0.0 }
 0x49d   :  { %v594_v23 = vpop.permute.xlu2 %593 }
 0x49e   :  { %614 = vmatpush.msra.mxu0 %v594_v23 }
 0x49f   :  { %567 = vrot.lane.b32.xlu0 %v1919_v48, %s1763_s27 }
 0x4a0   :  { %883 = vmatpush.msrb.mxu0 %v1891_v9 }
 0x4a2   :  { %884 = vmatpush.msrb.mxu0 %v1893_v10  ;;  %397 = vadd.xlane.f32.xlu1 %v396_v26 }
 0x4a4   :  { %885 = vmatpush.msrb.mxu0 %v1905_v39 }
 0x4a6   :  { %886 = vmatpush.msrb.mxu0 %v1908_v40  ;;  %v1979_v40 = vld [vmem:[#allocation2 + $0x30] sm:$0xff] }
 0x4a7   :  { %519 = vrot.lane.b32.xlu0 %v1923_v50, %s1760_s23  ;;  %478 = vmatpush.msrb.mxu3 %v1979_v40 }
 0x4bb   :  { %429 = vrot.lane.b32.xlu1 %v1923_v50, %s1762_s3 }
 0x4fe   :  { %v395_v28 = vpop.xlane.xlu0 %394 }
 0x4ff   :  { %1672 = vrcp.f32 %v395_v28 }
 0x505   :  { %v1673_v30 = vpop.eup %1672 }
 0x506   :  { %v401_v31 = vmul.f32 %v1673_v30, %v1667_v11 }
 0x508   :  { %1574 = vmatmul.msk.f32.vlgmr.msrb.gmra.mxu1 %vm380_vm4, %v401_v31 }
 0x50d   :  { %v559_v9 = vpop.xlane.xlu1 %558 }
 0x50e   :  { %1674 = vrcp.f32 %v559_v9 }
 0x511   :  { %v568_v10 = vpop.permute.xlu0 %567 }
 0x512   :  { %588 = vmatpush.msra.mxu2 %v568_v10  ;;  %v2017_v10 = vld [vmem:[#allocation2 + $0x113] ss:$0 sm:$0xff] }
 0x514   :  { %v1675_v32 = vpop.eup %1674  ;;  %737 = vmatpush.msrb.mxu2 %v2004_v17 }
 0x515   :  { %v565_v33 = vmul.f32 %v1675_v32, %v1669_v21  ;;  %v398_v35 = vpop.xlane.xlu1 %397 }
 0x516   :  { %1676 = vrcp.f32 %v398_v35  ;;  %738 = vmatpush.msrb.mxu2 %v2007_v18  ;;  %v2019_v35 = vld [vmem:[#allocation2 + $0x114] ss:$0 sm:$0xff] }
 0x517   :  { %1582 = vmatmul.msk.f32.vlgmr.msra.gmra.mxu2 %vm380_vm4, %v565_v33 }
 0x518   :  { %739 = vmatpush.msrb.mxu2 %v2010_v19 }
 0x519   :  { %v520_v39 = vpop.permute.xlu0 %519 }
 0x51c   :  { %v1677_v36 = vpop.eup %1676 }
 0x51d   :  { %v402_v37 = vmul.f32 %v1677_v36, %v1671_v25 }
 0x52d   :  { %v430_v38 = vpop.permute.xlu1 %429 }
 0x52e   :  { %450 = vmatpush.msra.mxu1 %v430_v38 }
 0x52f   :  { %1575 = vmatmul.msk.f32.vlgmr.msra.gmra.mxu1 %vm380_vm4, %v402_v37 }
 0x530   :  { %1580 = vmatpush.xpose.msk.msrb.mxu1 %vm189_vm10, %v520_v39  ;;  %v2025_v39 = vld [vmem:[#allocation2 + $0xa8] sm:$0xff] }
 0x531   :  { %790 = vmatpush.msra.mxu3 %v2025_v39 }
 0x534   :  { %641 = vmatpush.msra.mxu1 %v1982_v41 }
 0x536   :  { %642 = vmatpush.msra.mxu1 %v1985_v42 }
 0x537   :  { %1581 = vmatmul.msk.f32.vlgmr.msrb.gmra.mxu1 %vm189_vm10, %v518_v20  ;;  %v2012_v20 = vld [vmem:[#allocation2 + $0x50] sm:$0xff] }
 0x538   :  { %740 = vmatpush.msrb.mxu2 %v2012_v20 }
 0x585   :  { %v426_v44 = vpop.f32.mrf.mxu1 }
 0x586   :  { %1576 = vmatmul.msk.f32.vlgmr.msrb.gmra.mxu3 %vm189_vm10, %v426_v44  ;;  %v2028_v44 = vld [vmem:[#allocation2 + $0xa0] sm:$0xff] }
 0x587   :  { %791 = vmatpush.msra.mxu3 %v2028_v44 }
 0x59a   :  { %v590_v46 = vpop.f32.mrf.mxu2 }
 0x59b   :  { %1584 = vmatmul.msk.f32.vlgmr.msra.gmra.mxu1 %vm189_vm10, %v590_v46  ;;  %v2031_v46 = vld [vmem:[#allocation2 + $0x98] sm:$0xff] }
 0x59c   :  { %792 = vmatpush.msra.mxu3 %v2031_v46 }
 0x5ac   :  { %v452_v47 = vpop.f32.mrf.mxu1 }
 0x5ad   :  { %1577 = vmatmul.msk.f32.gmra.mxu3 %vm189_vm10, %v452_v47  ;;  %v2033_v47 = vld [vmem:[#allocation2 + $0x90] sm:$0xff] }
 0x5ae   :  { %793 = vmatpush.msra.mxu3 %v2033_v47 }
 0x5b4   :  { %v542_v48 = vpop.f32.mrf.mxu1 }
 0x5b5   :  { %v543_v49 = vadd.f32 %v542_v48, %v1946_v63  ;;  %v2036_v48 = vld [vmem:[#allocation2 + $0x88] sm:$0xff] }
 0x5b6   :  { %794 = vmatpush.msra.mxu3 %v2036_v48 }
 0x5b7   :  { %v548_v50 = vsel %vm380_vm4, %v543_v49, -inf }
 0x5b8   :  { %549 = vmax.xlane.f32.xlu1 %v548_v50  ;;  %v2042_v50 = vld [vmem:[#allocation2 + $0x78] sm:$0xff] }
 0x609   :  { %v480_v52 = vpop.f32.mrf.mxu3 }
 0x60a   :  { %v487_v53 = vadd.f32 %v1993_v51, %v480_v52  ;;  %v2045_v52 = vld [vmem:[#allocation2 + $0x70] sm:$0xff] }
 0x618   :  { %v644_v54 = vpop.f32.mrf.mxu1 }
 0x619   :  { %v650_v55 = vadd.f32 %v644_v54, %v487_v53  ;;  %v1645_v53 = vld [vmem:[#allocation2 + $0x115] ss:$0 sm:$0xff] }
 0x61b   :  { %v652_v56 = vadd.f32 %v650_v55, %v1911_v43 }
 0x61d   :  { %v656_v57 = vsel %vm291_vm2, %v652_v56, 0.0 }
 0x61e   :  { %657 = vadd.xlane.f32.xlu2 %v656_v57 }
 0x62b   :  { %v550_v59 = vpop.xlane.xlu1 %549 }
 0x62c   :  { %v552_v60 = vsub.f32 %v543_v49, %v550_v59  ;;  %v2039_v49 = vld [vmem:[#allocation2 + $0x80] sm:$0xff] }
 0x62d   :  { %795 = vmatpush.msra.mxu3 %v2039_v49 }
 0x62e   :  { %v555_v61 = vmul.f32 1.442695, %v552_v60 }
 0x62f   :  { %796 = vmatpush.msra.mxu3 %v2042_v50 }
 0x630   :  { %1678 = vpow2.f32 %v555_v61  ;;  %v483_v54 = vpop.f32.mrf.mxu3 }
 0x631   :  { %1680 = vrcp.f32 %v1764_v1  ;;  %797 = vmatpush.msra.mxu3 %v2045_v52  ;;  %v488_v57 = vadd.f32 %v1993_v51, %v483_v54 }
 0x636   :  { %v1679_v62 = vpop.eup %1678 }
 0x637   :  { %v560_v0 = vsel %vm380_vm4, %v1679_v62, 0.0  ;;  %v1681_v2 = vpop.eup %1680 }
 0x638   :  { %561 = vadd.xlane.f32.xlu0 %v560_v0  ;;  %v663_v3 = vmul.f32 32.0, %v1681_v2  ;;  %vm667_vm5 = vweird.f32 %v1681_v2 }
 0x63a   :  { %v664_v4 = vsub.f32 1.0, %v663_v3 }
 0x63c   :  { %v665_v5 = vmul.f32 %v1681_v2, %v664_v4 }
 0x63e   :  { %v666_v6 = vadd.f32 %v1681_v2, %v665_v5 }
 0x640   :  { %v1999_v43 = vsel %vm667_vm5, %v1681_v2, %v666_v6 }
 0x691   :  { %v658_v7 = vpop.xlane.xlu2 %657 }
 0x692   :  { %v669_v8 = vmul.f32 %v1999_v43, %v658_v7 }
 0x694   :  { %v671_v11 = vsub.f32 %v652_v56, %v669_v8 }
 0x696   :  { %v673_v12 = vmul.f32 %v671_v11, %v671_v11 }
 0x698   :  { %v675_v13 = vsel %vm291_vm2, %v673_v12, 0.0 }
 0x699   :  { %676 = vadd.xlane.f32.xlu1 %v675_v13 }
 0x6ab   :  { %v562_v14 = vpop.xlane.xlu0 %561 }
 0x6ac   :  { %1682 = vrcp.f32 %v562_v14 }
 0x6b2   :  { %v1683_v15 = vpop.eup %1682 }
 0x6b3   :  { %v566_v16 = vmul.f32 %v1683_v15, %v1679_v62 }
 0x6b5   :  { %1583 = vmatmul.msk.f32.vlgmr.msra.gmra.mxu0 %vm380_vm4, %v566_v16 }
 0x70c   :  { %v677_v21 = vpop.xlane.xlu1 %676 }
 0x70d   :  { %v681_v22 = vmul.f32 %v677_v21, %v1999_v43 }
 0x70f   :  { %v683_v23 = vadd.f32 1e-12, %v681_v22 }
 0x711   :  { %1684 = vrsqrt.f32 %v683_v23  ;;  %vm691_vm7 = vweird.f32 %v683_v23 }
 0x717   :  { %v1685_v25 = vpop.eup %1684 }
 0x718   :  { %v686_v26 = vmul.f32 %v1685_v25, %v683_v23  ;;  %vm692_vm6 = vweird.f32 %v1685_v25 }
 0x719   :  { %vm693_vm8 = vmor %vm691_vm7, %vm692_vm6 }
 0x71a   :  { %v687_v28 = vmul.f32 %v1685_v25, %v686_v26 }
 0x71c   :  { %v688_v30 = vmul.f32 0.5, %v687_v28 }
 0x71e   :  { %v689_v31 = vsub.f32 1.5, %v688_v30 }
 0x720   :  { %v690_v9 = vmul.f32 %v1685_v25, %v689_v31 }
 0x722   :  { %v694_v32 = vsel %vm693_vm8, %v1685_v25, %v690_v9 }
 0x723   :  { %v705_v33 = vmul.f32 %v694_v32, %v671_v11 }
 0x725   :  { %v708_v36 = vmul.f32 %v2017_v10, %v705_v33 }
 0x727   :  { %v711_v37 = vadd.f32 %v2019_v35, %v708_v36 }
 0x729   :  { %1586 = vmatmul.msk.f32.vlgmr.msrb.gmra.mxu2 %vm291_vm2, %v711_v37 }
 0x732   :  { %v616_v38 = vpop.f32.mrf.mxu0 }
 0x733   :  { %1585 = vmatmul.msk.f32.gmra.mxu1 %vm189_vm10, %v616_v38 }
 0x7ac   :  { %v742_v55 = vpop.f32.mrf.mxu2 }
 0x7ad   :  { %v743_v56 = vadd.f32 %v1645_v53, %v742_v55 }
 0x7af   :  { %v750_v59 = vmul.f32 0.044715, %v743_v56  ;;  %v748_v6 = vmul.f32 0.5, %v743_v56 }
 0x7b0   :  { %v647_v60 = vpop.f32.mrf.mxu1 }
 0x7b1   :  { %v752_v61 = vmul.f32 %v750_v59, %v743_v56  ;;  %v651_v62 = vadd.f32 %v647_v60, %v488_v57 }
 0x7b3   :  { %v754_v0 = vmul.f32 %v752_v61, %v743_v56  ;;  %v653_v1 = vadd.f32 %v651_v62, %v1915_v45  ;;  %v2055_v45 = vld [vmem:[#allocation2 + $0x116] ss:$0 sm:$0xff] }
 0x7b5   :  { %v756_v2 = vadd.f32 %v754_v0, %v743_v56  ;;  %v659_v3 = vsel %vm291_vm2, %v653_v1, 0.0 }
 0x7b6   :  { %660 = vadd.xlane.f32.xlu0 %v659_v3 }
 0x7b7   :  { %v758_v4 = vmul.f32 0.7978846, %v756_v2 }
 0x7b9   :  { %1686 = vtanh.f32 %v758_v4 }
 0x7bf   :  { %v1687_v5 = vpop.eup %1686 }
 0x7c0   :  { %v762_v7 = vadd.f32 1.0, %v1687_v5 }
 0x7c2   :  { %v764_v8 = vmul.f32 %v762_v7, %v748_v6 }
 0x7c4   :  { %1588 = vmatmul.msk.f32.vlgmr.msra.gmra.mxu3 %vm77_vm3, %v764_v8 }
 0x829   :  { %v661_v51 = vpop.xlane.xlu0 %660 }
 0x82a   :  { %v670_v11 = vmul.f32 %v1999_v43, %v661_v51 }
 0x82c   :  { %v672_v12 = vsub.f32 %v653_v1, %v670_v11 }
 0x82e   :  { %v674_v13 = vmul.f32 %v672_v12, %v672_v12 }
 0x830   :  { %v678_v14 = vsel %vm291_vm2, %v674_v13, 0.0  ;;  %v1647_v13 = vld [vmem:[#allocation2 + $0x117] ss:$0 sm:$0xff] }
 0x831   :  { %679 = vadd.xlane.f32.xlu1 %v678_v14 }
 0x847   :  { %v799_v15 = vpop.f32.mrf.mxu3 }
 0x848   :  { %v800_v16 = vadd.f32 %v2055_v45, %v799_v15 }
 0x84a   :  { %v805_v21 = vadd.f32 %v800_v16, %v711_v37  ;;  %v1648_v16 = vld [vmem:[#allocation2 + $0x118] ss:$0 sm:$0xff] }
 0x84c   :  { %v809_v22 = vsel %vm291_vm2, %v805_v21, 0.0 }
 0x84d   :  { %810 = vadd.xlane.f32.xlu0 %v809_v22 }
 0x8a4   :  { %v680_v23 = vpop.xlane.xlu1 %679 }
 0x8a5   :  { %v682_v25 = vmul.f32 %v680_v23, %v1999_v43 }
 0x8a7   :  { %v684_v26 = vadd.f32 1e-12, %v682_v25 }
 0x8a9   :  { %1688 = vrsqrt.f32 %v684_v26  ;;  %vm701_vm11 = vweird.f32 %v684_v26 }
 0x8af   :  { %v1689_v28 = vpop.eup %1688 }
 0x8b0   :  { %v696_v30 = vmul.f32 %v1689_v28, %v684_v26  ;;  %vm702_vm9 = vweird.f32 %v1689_v28 }
 0x8b1   :  { %vm703_vm12 = vmor %vm701_vm11, %vm702_vm9 }
 0x8b2   :  { %v697_v31 = vmul.f32 %v1689_v28, %v696_v30 }
 0x8b4   :  { %v698_v9 = vmul.f32 0.5, %v697_v31 }
 0x8b6   :  { %v699_v32 = vsub.f32 1.5, %v698_v9 }
 0x8b8   :  { %v700_v33 = vmul.f32 %v1689_v28, %v699_v32 }
 0x8ba   :  { %v704_v36 = vsel %vm703_vm12, %v1689_v28, %v700_v33  ;;  %v1649_v28 = vld [vmem:[#allocation2 + $0x111] ss:$0 sm:$0xff] }
 0x8bb   :  { %v706_v38 = vmul.f32 %v704_v36, %v672_v12 }
 0x8bd   :  { %v709_v37 = vmul.f32 %v2017_v10, %v706_v38 }
 0x8bf   :  { %v712_v54 = vadd.f32 %v2019_v35, %v709_v37 }
 0x8c0   :  { %v811_v55 = vpop.xlane.xlu0 %810 }
 0x8c1   :  { %v815_v56 = vmul.f32 %v811_v55, %v1999_v43  ;;  %1587 = vmatmul.msk.f32.gmra.mxu2 %vm291_vm2, %v712_v54 }
 0x8c3   :  { %v817_v57 = vsub.f32 %v805_v21, %v815_v56 }
 0x8c5   :  { %v819_v59 = vmul.f32 %v817_v57, %v817_v57 }
 0x8c7   :  { %v821_v60 = vsel %vm291_vm2, %v819_v59, 0.0 }
 0x8c8   :  { %822 = vadd.xlane.f32.xlu1 %v821_v60 }
 0x93b   :  { %v823_v61 = vpop.xlane.xlu1 %822 }
 0x93c   :  { %v827_v62 = vmul.f32 %v823_v61, %v1999_v43 }
 0x93e   :  { %v829_v0 = vadd.f32 1e-12, %v827_v62 }
 0x940   :  { %1690 = vrsqrt.f32 %v829_v0  ;;  %vm837_vm14 = vweird.f32 %v829_v0 }
 0x944   :  { %v745_v1 = vpop.f32.mrf.mxu2 }
 0x945   :  { %v746_v2 = vadd.f32 %v1645_v53, %v745_v1 }
 0x946   :  { %v1691_v10 = vpop.eup %1690 }
 0x947   :  { %v832_v3 = vmul.f32 %v1691_v10, %v829_v0  ;;  %v751_v35 = vmul.f32 0.044715, %v746_v2  ;;  %vm838_vm13 = vweird.f32 %v1691_v10  ;;  %v749_v23 = vmul.f32 0.5, %v746_v2 }
 0x948   :  { %vm839_vm15 = vmor %vm837_vm14, %vm838_vm13 }
 0x949   :  { %v833_v4 = vmul.f32 %v1691_v10, %v832_v3  ;;  %v753_v5 = vmul.f32 %v751_v35, %v746_v2 }
 0x94b   :  { %v834_v6 = vmul.f32 0.5, %v833_v4  ;;  %v755_v7 = vmul.f32 %v753_v5, %v746_v2 }
 0x94d   :  { %v835_v8 = vsub.f32 1.5, %v834_v6  ;;  %v757_v51 = vadd.f32 %v755_v7, %v746_v2 }
 0x94f   :  { %v836_v11 = vmul.f32 %v1691_v10, %v835_v8  ;;  %v759_v12 = vmul.f32 0.7978846, %v757_v51 }
 0x951   :  { %v840_v14 = vsel %vm839_vm15, %v1691_v10, %v836_v11  ;;  %1692 = vtanh.f32 %v759_v12 }
 0x952   :  { %v851_v15 = vmul.f32 %v840_v14, %v817_v57 }
 0x954   :  { %v854_v53 = vmul.f32 %v1647_v13, %v851_v15 }
 0x956   :  { %v2066_v21 = vadd.f32 %v1648_v16, %v854_v53 }
 0x957   :  { %v1693_v22 = vpop.eup %1692 }
 0x958   :  { %1590 = vmatmul.msk.f32.vlgmr.msrb.gmra.mxu0 %vm291_vm2, %v2066_v21  ;;  %v763_v25 = vadd.f32 1.0, %v1693_v22 }
 0x95a   :  { %v765_v26 = vmul.f32 %v763_v25, %v749_v23 }
 0x95c   :  { %1589 = vmatmul.msk.f32.gmra.mxu3 %vm77_vm3, %v765_v26 }
 0x9d5   :  { %v888_v30 = vpop.f32.mrf.mxu0 }
 0x9d6   :  { %v2071_v31 = vadd.f32 %v1649_v28, %v888_v30 }
 0x9d8   :  { %896 = vrot.lane.b32.xlu1 %v2071_v31, %s1759_s0 }
 0x9df   :  { %v802_v9 = vpop.f32.mrf.mxu3 }
 0x9e0   :  { %v803_v32 = vadd.f32 %v2055_v45, %v802_v9  ;;  %1059 = vrot.lane.b32.xlu1 %v2071_v31, %s1760_s23 }
 0x9e2   :  { %v806_v33 = vadd.f32 %v803_v32, %v712_v54 }
 0x9e4   :  { %v812_v36 = vsel %vm291_vm2, %v806_v33, 0.0 }
 0x9e5   :  { %813 = vadd.xlane.f32.xlu0 %v812_v36 }
 0xa4a   :  { %v897_v38 = vpop.permute.xlu1 %896 }
 0xa4b   :  { %1592 = vmatpush.xpose.msk.msrb.mxu1 %vm189_vm10, %v897_v38 }
 0xa4e   :  { %1593 = vmatmul.msk.f32.vlgmr.msrb.gmra.mxu1 %vm189_vm10, %v2071_v31 }
 0xa4f   :  { %1045 = vmatpush.msra.mxu1 %v1973_v34 }
 0xa51   :  { %1046 = vmatpush.msra.mxu1 %v1979_v40 }
 0xa52   :  { %v1060_v8 = vpop.permute.xlu1 %1059 }
 0xa53   :  { %1351 = vmatpush.msrb.mxu1 %v2025_v39 }
 0xa55   :  { %1352 = vmatpush.msrb.mxu1 %v2028_v44 }
 0xa57   :  { %1353 = vmatpush.msrb.mxu1 %v2031_v46 }
 0xa58   :  { %v814_v45 = vpop.xlane.xlu0 %813 }
 0xa59   :  { %1354 = vmatpush.msrb.mxu1 %v2033_v47  ;;  %v816_v37 = vmul.f32 %v814_v45, %v1999_v43 }
 0xa5b   :  { %1355 = vmatpush.msrb.mxu1 %v2036_v48  ;;  %v818_v34 = vsub.f32 %v806_v33, %v816_v37 }
 0xa5d   :  { %1356 = vmatpush.msrb.mxu1 %v2039_v49  ;;  %v820_v54 = vmul.f32 %v818_v34, %v818_v34 }
 0xa5f   :  { %1357 = vmatpush.msrb.mxu1 %v2042_v50  ;;  %v824_v40 = vsel %vm291_vm2, %v820_v54, 0.0 }
 0xa60   :  { %825 = vadd.xlane.f32.xlu0 %v824_v40 }
 0xa61   :  { %1358 = vmatpush.msrb.mxu1 %v2045_v52 }
 0xacb   :  { %v919_v39 = vpop.f32.mrf.mxu1 }
 0xacc   :  { %v920_v44 = vadd.f32 %v919_v39, %v1942_v58 }
 0xace   :  { %v949_v46 = vsel %vm380_vm4, %v920_v44, -inf }
 0xacf   :  { %950 = vmax.xlane.f32.xlu2 %v949_v46 }
 0xad3   :  { %v826_v47 = vpop.xlane.xlu0 %825 }
 0xad4   :  { %v828_v48 = vmul.f32 %v826_v47, %v1999_v43 }
 0xad6   :  { %v830_v55 = vadd.f32 1e-12, %v828_v48 }
 0xad8   :  { %1694 = vrsqrt.f32 %v830_v55  ;;  %vm847_vm1 = vweird.f32 %v830_v55 }
 0xade   :  { %v1695_v49 = vpop.eup %1694 }
 0xadf   :  { %v842_v56 = vmul.f32 %v1695_v49, %v830_v55  ;;  %vm848_vm0 = vweird.f32 %v1695_v49 }
 0xae0   :  { %vm849_vm5 = vmor %vm847_vm1, %vm848_vm0 }
 0xae1   :  { %v843_v50 = vmul.f32 %v1695_v49, %v842_v56 }
 0xae3   :  { %v844_v57 = vmul.f32 0.5, %v843_v50 }
 0xae5   :  { %v845_v59 = vsub.f32 1.5, %v844_v57 }
 0xae7   :  { %v846_v52 = vmul.f32 %v1695_v49, %v845_v59 }
 0xae9   :  { %v850_v60 = vsel %vm849_vm5, %v1695_v49, %v846_v52 }
 0xaea   :  { %v852_v61 = vmul.f32 %v850_v60, %v818_v34 }
 0xaec   :  { %v855_v62 = vmul.f32 %v1647_v13, %v852_v61 }
 0xaee   :  { %v2097_v0 = vadd.f32 %v1648_v16, %v855_v62 }
 0xaf0   :  { %1591 = vmatmul.msk.f32.gmra.mxu0 %vm291_vm2, %v2097_v0 }
 0xb42   :  { %v951_v1 = vpop.xlane.xlu2 %950 }
 0xb43   :  { %v955_v2 = vsub.f32 %v920_v44, %v951_v1 }
 0xb45   :  { %v957_v10 = vmul.f32 1.442695, %v955_v2 }
 0xb47   :  { %1696 = vpow2.f32 %v957_v10 }
 0xb4d   :  { %v1697_v3 = vpop.eup %1696 }
 0xb4e   :  { %v961_v35 = vsel %vm380_vm4, %v1697_v3, 0.0 }
 0xb4f   :  { %962 = vadd.xlane.f32.xlu0 %v961_v35 }
 0xb63   :  { %971 = vrot.lane.b32.xlu0 %v2071_v31, %s1762_s3 }
 0xb6d   :  { %v891_v4 = vpop.f32.mrf.mxu0 }
 0xb6e   :  { %v2104_v5 = vadd.f32 %v1649_v28, %v891_v4 }
 0xb70   :  { %1087 = vrot.lane.b32.xlu1 %v2104_v5, %s1760_s23  ;;  %923 = vrot.lane.b32.xlu2 %v2104_v5, %s1759_s0  ;;  %v1633_v48 = vpack.i.bf16 %v2104_v5, %v2071_v31 }
 0xb71   :  { %1085 = vrot.lane.b32.xlu0 %v2104_v5, %s1761_s24 }
 0xb78   :  { %1057 = vrot.lane.b32.xlu2 %v2071_v31, %s1761_s24 }
 0xbc2   :  { %v963_v6 = vpop.xlane.xlu0 %962 }
 0xbc3   :  { %1698 = vrcp.f32 %v963_v6 }
 0xbc9   :  { %v1699_v51 = vpop.eup %1698 }
 0xbca   :  { %v924_v7 = vpop.permute.xlu2 %923  ;;  %v969_v11 = vmul.f32 %v1699_v51, %v1697_v3 }
 0xbcb   :  { %1594 = vmatpush.xpose.msk.msra.mxu2 %vm189_vm10, %v924_v7 }
 0xbce   :  { %1595 = vmatmul.msk.f32.vlgmr.msra.gmra.mxu2 %vm189_vm10, %v2104_v5 }
 0xbcf   :  { %1600 = vmatpush.xpose.msk.msrb.mxu2 %vm189_vm10, %v1060_v8 }
 0xbd2   :  { %v1058_v12 = vpop.permute.xlu2 %1057 }
 0xbd5   :  { %v972_v13 = vpop.permute.xlu0 %971 }
 0xbd6   :  { %992 = vmatpush.msrb.mxu3 %v972_v13  ;;  %1601 = vmatmul.msk.f32.vlgmr.msrb.gmra.mxu2 %vm189_vm10, %v1058_v12 }
 0xbd7   :  { %1596 = vmatmul.msk.f32.vlgmr.msrb.gmra.mxu3 %vm380_vm4, %v969_v11 }
 0xbe2   :  { %v1088_v14 = vpop.permute.xlu1 %1087 }
 0xbe3   :  { %1602 = vmatpush.xpose.msk.msra.mxu3 %vm189_vm10, %v1088_v14  ;;  %v1086_v15 = vpop.permute.xlu0 %1085 }
 0xbe6   :  { %1603 = vmatmul.msk.f32.vlgmr.msra.gmra.mxu3 %vm189_vm10, %v1086_v15 }
 0xbe7   :  { %1209 = vmatpush.msrb.mxu3 %v1982_v41 }
 0xbe9   :  { %1210 = vmatpush.msrb.mxu3 %v1985_v42 }
 0xc51   :  { %v946_v16 = vpop.f32.mrf.mxu2 }
 0xc52   :  { %v947_v53 = vadd.f32 %v946_v16, %v1946_v63 }
 0xc54   :  { %v952_v22 = vsel %vm380_vm4, %v947_v53, -inf }
 0xc55   :  { %953 = vmax.xlane.f32.xlu1 %v952_v22 }
 0xc59   :  { %v1082_v23 = vpop.f32.mrf.mxu2 }
 0xc5a   :  { %v1083_v25 = vadd.f32 %v1082_v23, %v1942_v58  ;;  %v994_v26 = vpop.f32.mrf.mxu3 }
 0xc5b   :  { %1598 = vmatmul.msk.f32.vlgmr.msra.gmra.mxu1 %vm189_vm10, %v994_v26 }
 0xc5c   :  { %v1113_v28 = vsel %vm380_vm4, %v1083_v25, -inf }
 0xc5d   :  { %1114 = vmax.xlane.f32.xlu2 %v1113_v28 }
 0xc69   :  { %v1110_v41 = vpop.f32.mrf.mxu3 }
 0xc6a   :  { %v1111_v30 = vadd.f32 %v1110_v41, %v1946_v63 }
 0xc6c   :  { %v1116_v42 = vsel %vm380_vm4, %v1111_v30, -inf }
 0xc6d   :  { %1117 = vmax.xlane.f32.xlu0 %v1116_v42 }
 0xc81   :  { %997 = vrot.lane.b32.xlu0 %v2104_v5, %s1762_s3 }
 0xcc8   :  { %v954_v9 = vpop.xlane.xlu1 %953 }
 0xcc9   :  { %v956_v32 = vsub.f32 %v947_v53, %v954_v9 }
 0xccb   :  { %v959_v33 = vmul.f32 1.442695, %v956_v32 }
 0xccd   :  { %1700 = vpow2.f32 %v959_v33 }
 0xcd0   :  { %v1115_v58 = vpop.xlane.xlu2 %1114 }
 0xcd1   :  { %v1119_v36 = vsub.f32 %v1083_v25, %v1115_v58 }
 0xcd3   :  { %v1701_v38 = vpop.eup %1700  ;;  %v1121_v45 = vmul.f32 1.442695, %v1119_v36 }
 0xcd4   :  { %v964_v37 = vsel %vm380_vm4, %v1701_v38, 0.0 }
 0xcd5   :  { %1702 = vpow2.f32 %v1121_v45  ;;  %965 = vadd.xlane.f32.xlu1 %v964_v37 }
 0xcdb   :  { %v1703_v34 = vpop.eup %1702 }
 0xcdc   :  { %v1125_v63 = vsel %vm380_vm4, %v1703_v34, 0.0 }
 0xcdd   :  { %1126 = vadd.xlane.f32.xlu2 %v1125_v63 }
 0xce0   :  { %v1118_v54 = vpop.xlane.xlu0 %1117 }
 0xce1   :  { %v1120_v40 = vsub.f32 %v1111_v30, %v1118_v54  ;;  %v1652_v54 = vld [vmem:[#allocation2 + $0x114] ss:$0 sm:$0xff] }
 0xce3   :  { %v1123_v39 = vmul.f32 1.442695, %v1120_v40 }
 0xce5   :  { %1704 = vpow2.f32 %v1123_v39 }
 0xceb   :  { %v1705_v44 = vpop.eup %1704 }
 0xcec   :  { %v1128_v46 = vsel %vm380_vm4, %v1705_v44, 0.0 }
 0xced   :  { %1129 = vadd.xlane.f32.xlu1 %v1128_v46 }
 0xcf3   :  { %v998_v47 = vpop.permute.xlu0 %997 }
 0xcf4   :  { %1018 = vmatpush.msra.mxu0 %v998_v47 }
 0xcf5   :  { %1634 = vrot.lane.b32.xlu2 %v1633_v48, %s1763_s27 }
 0xd48   :  { %v966_v55 = vpop.xlane.xlu1 %965 }
 0xd49   :  { %1706 = vrcp.f32 %v966_v55 }
 0xd4f   :  { %v1707_v49 = vpop.eup %1706 }
 0xd50   :  { %v970_v56 = vmul.f32 %v1707_v49, %v1701_v38  ;;  %v1127_v50 = vpop.xlane.xlu2 %1126  ;;  %v1651_v38 = vld [vmem:[#allocation2 + $0x113] ss:$0 sm:$0xff] }
 0xd51   :  { %1708 = vrcp.f32 %v1127_v50 }
 0xd52   :  { %1597 = vmatmul.msk.f32.vlgmr.msra.gmra.mxu0 %vm380_vm4, %v970_v56 }
 0xd57   :  { %v1709_v57 = vpop.eup %1708 }
 0xd58   :  { %v1635_v59 = vpop.permute.xlu2 %1634  ;;  %v1133_v61 = vmul.f32 %v1709_v57, %v1703_v34 }
 0xd59   :  { %v1637_v52 = vunpack.i.h.bf16 %v1635_v59  ;;  %v1636_v60 = vunpack.i.l.bf16 %v1635_v59 }
 0xd5b   :  { %1156 = vmatpush.msrb.mxu0 %v1636_v60  ;;  %1182 = vmatpush.msra.mxu2 %v1637_v52  ;;  %v1653_v52 = vld [vmem:[#allocation2 + $0x115] ss:$0 sm:$0xff] }
 0xd5c   :  { %1604 = vmatmul.msk.f32.vlgmr.msrb.gmra.mxu0 %vm380_vm4, %v1133_v61 }
 0xd5d   :  { %1298 = vmatpush.msra.mxu0 %v2004_v17  ;;  %v1650_v17 = vld [vmem:[#allocation2 + $0x112] ss:$0 sm:$0xff] }
 0xd5f   :  { %1299 = vmatpush.msra.mxu0 %v2007_v18  ;;  %v1048_v18 = vpop.f32.mrf.mxu1 }
 0xd60   :  { %v1130_v31 = vpop.xlane.xlu1 %1129  ;;  %v1055_v35 = vadd.f32 %v1650_v17, %v1048_v18 }
 0xd61   :  { %1710 = vrcp.f32 %v1130_v31  ;;  %1300 = vmatpush.msra.mxu0 %v2010_v19 }
 0xd63   :  { %1301 = vmatpush.msra.mxu0 %v2012_v20 }
 0xd67   :  { %v1711_v62 = vpop.eup %1710 }
 0xd68   :  { %v1134_v1 = vmul.f32 %v1711_v62, %v1705_v44 }
 0xd6a   :  { %1605 = vmatmul.msk.f32.vlgmr.msra.gmra.mxu2 %vm380_vm4, %v1134_v1 }
 0xdcf   :  { %v1020_v2 = vpop.f32.mrf.mxu0 }
 0xdd0   :  { %1599 = vmatmul.msk.f32.gmra.mxu1 %vm189_vm10, %v1020_v2 }
 0xdd9   :  { %v1158_v10 = vpop.f32.mrf.mxu0 }
 0xdda   :  { %1606 = vmatmul.msk.f32.vlgmr.msrb.gmra.mxu3 %vm189_vm10, %v1158_v10 }
 0xded   :  { %v1184_v3 = vpop.f32.mrf.mxu2 }
 0xdee   :  { %1607 = vmatmul.msk.f32.gmra.mxu3 %vm189_vm10, %v1184_v3 }
 0xe4d   :  { %v1051_v6 = vpop.f32.mrf.mxu1 }
 0xe4e   :  { %v1056_v7 = vadd.f32 %v1650_v17, %v1051_v6 }
 0xe5d   :  { %v1212_v4 = vpop.f32.mrf.mxu3 }
 0xe5e   :  { %v1218_v19 = vadd.f32 %v1212_v4, %v1055_v35 }
 0xe60   :  { %v1220_v20 = vadd.f32 %v1218_v19, %v2066_v21 }
 0xe62   :  { %v1224_v5 = vsel %vm291_vm2, %v1220_v20, 0.0 }
 0xe63   :  { %1225 = vadd.xlane.f32.xlu1 %v1224_v5 }
 0xe71   :  { %v1215_v8 = vpop.f32.mrf.mxu3 }
 0xe72   :  { %v1219_v51 = vadd.f32 %v1215_v8, %v1056_v7 }
 0xe74   :  { %v1221_v11 = vadd.f32 %v1219_v51, %v2097_v0 }
 0xe76   :  { %v1227_v12 = vsel %vm291_vm2, %v1221_v11, 0.0 }
 0xe77   :  { %1228 = vadd.xlane.f32.xlu1 %v1227_v12 }
 0xed6   :  { %v1226_v13 = vpop.xlane.xlu1 %1225 }
 0xed7   :  { %v1230_v14 = vmul.f32 %v1226_v13, %v1999_v43 }
 0xed9   :  { %v1232_v15 = vsub.f32 %v1220_v20, %v1230_v14  ;;  %v1654_v14 = vld [vmem:[#allocation2 + $0x116] ss:$0 sm:$0xff] }
 0xedb   :  { %v1234_v16 = vmul.f32 %v1232_v15, %v1232_v15 }
 0xedd   :  { %v1236_v53 = vsel %vm291_vm2, %v1234_v16, 0.0 }
 0xede   :  { %1237 = vadd.xlane.f32.xlu0 %v1236_v53 }
 0xeea   :  { %v1229_v21 = vpop.xlane.xlu1 %1228 }
 0xeeb   :  { %v1231_v22 = vmul.f32 %v1229_v21, %v1999_v43 }
 0xeed   :  { %v1233_v23 = vsub.f32 %v1221_v11, %v1231_v22 }
 0xeef   :  { %v1235_v25 = vmul.f32 %v1233_v23, %v1233_v23 }
 0xef1   :  { %v1239_v26 = vsel %vm291_vm2, %v1235_v25, 0.0 }
 0xef2   :  { %1240 = vadd.xlane.f32.xlu1 %v1239_v26 }
 0xf51   :  { %v1238_v0 = vpop.xlane.xlu0 %1237 }
 0xf52   :  { %v1242_v28 = vmul.f32 %v1238_v0, %v1999_v43 }
 0xf54   :  { %v1244_v41 = vadd.f32 1e-12, %v1242_v28 }
 0xf56   :  { %1712 = vrsqrt.f32 %v1244_v41  ;;  %vm1252_vm6 = vweird.f32 %v1244_v41 }
 0xf5c   :  { %v1713_v30 = vpop.eup %1712 }
 0xf5d   :  { %v1247_v42 = vmul.f32 %v1713_v30, %v1244_v41  ;;  %vm1253_vm4 = vweird.f32 %v1713_v30 }
 0xf5e   :  { %vm1254_vm7 = vmor %vm1252_vm6, %vm1253_vm4 }
 0xf5f   :  { %v1248_v9 = vmul.f32 %v1713_v30, %v1247_v42 }
 0xf61   :  { %v1249_v32 = vmul.f32 0.5, %v1248_v9 }
 0xf63   :  { %v1250_v33 = vsub.f32 1.5, %v1249_v32 }
 0xf65   :  { %v1251_v58 = vmul.f32 %v1713_v30, %v1250_v33  ;;  %v1241_v36 = vpop.xlane.xlu1 %1240 }
 0xf66   :  { %v1243_v45 = vmul.f32 %v1241_v36, %v1999_v43 }
 0xf67   :  { %v1255_v37 = vsel %vm1254_vm7, %v1713_v30, %v1251_v58 }
 0xf68   :  { %v1266_v34 = vmul.f32 %v1255_v37, %v1232_v15  ;;  %v1245_v63 = vadd.f32 1e-12, %v1243_v45  ;;  %v1508_v45 = vld [vmem:[#allocation2 + $0x100] sm:$0xff] }
 0xf6a   :  { %v1269_v40 = vmul.f32 %v1651_v38, %v1266_v34  ;;  %1714 = vrsqrt.f32 %v1245_v63  ;;  %vm1262_vm9 = vweird.f32 %v1245_v63  ;;  %v1507_v34 = vld [vmem:[#allocation2 + $0xf8] sm:$0xff] }
 0xf6c   :  { %v1272_v39 = vadd.f32 %v1652_v54, %v1269_v40 }
 0xf6e   :  { %1608 = vmatmul.msk.f32.vlgmr.msra.gmra.mxu0 %vm291_vm2, %v1272_v39 }
 0xf70   :  { %v1715_v44 = vpop.eup %1714 }
 0xf71   :  { %v1257_v46 = vmul.f32 %v1715_v44, %v1245_v63  ;;  %vm1263_vm8 = vweird.f32 %v1715_v44 }
 0xf72   :  { %vm1264_vm11 = vmor %vm1262_vm9, %vm1263_vm8 }
 0xf73   :  { %v1258_v47 = vmul.f32 %v1715_v44, %v1257_v46 }
 0xf75   :  { %v1259_v48 = vmul.f32 0.5, %v1258_v47 }
 0xf77   :  { %v1260_v55 = vsub.f32 1.5, %v1259_v48 }
 0xf79   :  { %v1261_v49 = vmul.f32 %v1715_v44, %v1260_v55 }
 0xf7b   :  { %v1265_v56 = vsel %vm1264_vm11, %v1715_v44, %v1261_v49 }
 0xf7c   :  { %v1267_v50 = vmul.f32 %v1265_v56, %v1233_v23 }
 0xf7e   :  { %v1270_v57 = vmul.f32 %v1651_v38, %v1267_v50  ;;  %v1509_v38 = vld [vmem:[#allocation2 + $0x108] sm:$0xff] }
 0xf7f   :  { %1530 = vmatpush.msrb.mxu0 %v1509_v38 }
 0xf80   :  { %v1273_v59 = vadd.f32 %v1652_v54, %v1270_v57  ;;  %v1506_v54 = vld [vmem:[#allocation2 + $0xf0] sm:$0xff] }
 0xf81   :  { %1531 = vmatpush.msrb.mxu0 %v1508_v45 }
 0xf82   :  { %1609 = vmatmul.msk.f32.gmra.mxu0 %vm291_vm2, %v1273_v59 }
 0xf83   :  { %1532 = vmatpush.msrb.mxu0 %v1507_v34 }
 0xf85   :  { %1533 = vmatpush.msrb.mxu0 %v1506_v54 }
 0xfeb   :  { %v1303_v60 = vpop.f32.mrf.mxu0 }
 0xfec   :  { %v1304_v61 = vadd.f32 %v1653_v52, %v1303_v60 }
 0xfee   :  { %v1311_v31 = vmul.f32 0.044715, %v1304_v61  ;;  %v1309_v17 = vmul.f32 0.5, %v1304_v61 }
 0xff0   :  { %v1313_v62 = vmul.f32 %v1311_v31, %v1304_v61 }
 0xff2   :  { %v1315_v1 = vmul.f32 %v1313_v62, %v1304_v61  ;;  %v1656_v62 = vld [vmem:[#allocation2 + $0x118] ss:$0 sm:$0xff] }
 0xff4   :  { %v1317_v2 = vadd.f32 %v1315_v1, %v1304_v61 }
 0xff6   :  { %v1319_v10 = vmul.f32 0.7978846, %v1317_v2 }
 0xff8   :  { %1716 = vtanh.f32 %v1319_v10 }
 0xffe   :  { %v1717_v3 = vpop.eup %1716 }
 0xfff   :  { %v1306_v18 = vpop.f32.mrf.mxu0  ;;  %v1323_v35 = vadd.f32 1.0, %v1717_v3  ;;  %v1420_v3 = vmul.u32 8, %v1869_v27  ;;  %v1450_v27 = vld [vmem:[#allocation2 + $0xc8] sm:$0xff] }
0x1000   :  { %v1307_v4 = vadd.f32 %v1653_v52, %v1306_v18  ;;  %v1655_v52 = vld [vmem:[#allocation2 + $0x117] ss:$0 sm:$0xff] }
0x1001   :  { %v1325_v19 = vmul.f32 %v1323_v35, %v1309_v17  ;;  %vm1421_vm1 = vcmp.eq.s32.totalorder %v1861_v24, %v1420_v3  ;;  %v1480_v24 = vld [vmem:[#allocation2 + $0xe8] sm:$0xff] }
0x1002   :  { %v1312_v20 = vmul.f32 0.044715, %v1307_v4  ;;  %v1310_v11 = vmul.f32 0.5, %v1307_v4  ;;  %1498 = vmatpush.msra.mxu3 %v1480_v24 }
0x1003   :  { %1610 = vmatmul.msk.f32.vlgmr.msrb.gmra.mxu1 %vm77_vm3, %v1325_v19 }
0x1004   :  { %v1314_v5 = vmul.f32 %v1312_v20, %v1307_v4  ;;  %v1612_v20 = vsel %vm1421_vm1, 1.0, %v1757_v29  ;;  %v1657_v29 = vld [vmem:[#allocation2 + $0x11b] ss:$0 sm:$0xff] }
0x1006   :  { %v1316_v6 = vmul.f32 %v1314_v5, %v1307_v4  ;;  %v1449_v5 = vld [vmem:[#allocation2 + $0xc0] sm:$0xff] }
0x1008   :  { %v1318_v7 = vadd.f32 %v1316_v6, %v1307_v4  ;;  %v1448_v6 = vld [vmem:[#allocation2 + $0xb8] sm:$0xff] }
0x100a   :  { %v1320_v8 = vmul.f32 0.7978846, %v1318_v7  ;;  %v1447_v7 = vld [vmem:[#allocation2 + $0xb0] sm:$0xff] }
0x100c   :  { %1718 = vtanh.f32 %v1320_v8  ;;  %v1479_v8 = vld [vmem:[#allocation2 + $0xe0] sm:$0xff] }
0x100d   :  { %1499 = vmatpush.msra.mxu3 %v1479_v8 }
0x1012   :  { %v1719_v51 = vpop.eup %1718 }
0x1013   :  { %v1324_v12 = vadd.f32 1.0, %v1719_v51 }
0x1015   :  { %v1326_v13 = vmul.f32 %v1324_v12, %v1310_v11 }
0x1017   :  { %1611 = vmatmul.msk.f32.gmra.mxu1 %vm77_vm3, %v1326_v13 }
0x1080   :  { %v1360_v15 = vpop.f32.mrf.mxu1 }
0x1081   :  { %v1361_v16 = vadd.f32 %v1654_v14, %v1360_v15  ;;  %v1478_v15 = vld [vmem:[#allocation2 + $0xd8] sm:$0xff] }
0x1082   :  { %1500 = vmatpush.msra.mxu3 %v1478_v15 }
0x1083   :  { %v1366_v53 = vadd.f32 %v1361_v16, %v1272_v39  ;;  %v1477_v16 = vld [vmem:[#allocation2 + $0xd0] sm:$0xff] }
0x1084   :  { %1501 = vmatpush.msra.mxu3 %v1477_v16 }
0x1085   :  { %v1370_v21 = vsel %vm291_vm2, %v1366_v53, 0.0 }
0x1086   :  { %1371 = vadd.xlane.f32.xlu1 %v1370_v21 }
0x1094   :  { %v1363_v22 = vpop.f32.mrf.mxu1 }
0x1095   :  { %v1364_v23 = vadd.f32 %v1654_v14, %v1363_v22 }
0x1097   :  { %v1367_v25 = vadd.f32 %v1364_v23, %v1273_v59 }
0x1099   :  { %v1373_v26 = vsel %vm291_vm2, %v1367_v25, 0.0 }
0x109a   :  { %1374 = vadd.xlane.f32.xlu2 %v1373_v26 }
0x10f9   :  { %v1372_v0 = vpop.xlane.xlu1 %1371 }
0x10fa   :  { %v1376_v30 = vmul.f32 %v1372_v0, %v1999_v43 }
0x10fc   :  { %v1378_v32 = vsub.f32 %v1366_v53, %v1376_v30  ;;  %v1658_v53 = vld [vmem:[#allocation2 + $0x119] ss:$0 sm:$0xff] }
0x10fe   :  { %v1380_v58 = vmul.f32 %v1378_v32, %v1378_v32 }
0x1100   :  { %v1382_v36 = vsel %vm291_vm2, %v1380_v58, 0.0 }
0x110d   :  { %v1375_v28 = vpop.xlane.xlu2 %1374 }
0x110e   :  { %v1377_v41 = vmul.f32 %v1375_v28, %v1999_v43 }
0x1110   :  { %v1379_v42 = vsub.f32 %v1367_v25, %v1377_v41  ;;  %v1659_v25 = vld [vmem:[#allocation2 + $0x11a] ss:$0 sm:$0xff] }
0x1112   :  { %v1381_v9 = vmul.f32 %v1379_v42, %v1379_v42 }
0x1114   :  { %v1385_v33 = vsel %vm291_vm2, %v1381_v9, 0.0 }
0x1115   :  { %1386 = vadd.xlane.f32.xlu1 %v1385_v33 }
0x111d   :  { %1383 = vadd.xlane.f32.xlu1 %v1382_v36 }
0x1188   :  { %v1387_v37 = vpop.xlane.xlu1 %1386 }
0x1189   :  { %v1389_v63 = vmul.f32 %v1387_v37, %v1999_v43 }
0x118b   :  { %v1391_v40 = vadd.f32 1e-12, %v1389_v63 }
0x118d   :  { %1720 = vrsqrt.f32 %v1391_v40  ;;  %vm1408_vm12 = vweird.f32 %v1391_v40 }
0x1190   :  { %v1384_v39 = vpop.xlane.xlu1 %1383 }
0x1191   :  { %v1388_v44 = vmul.f32 %v1384_v39, %v1999_v43 }
0x1193   :  { %v1721_v46 = vpop.eup %1720  ;;  %v1390_v47 = vadd.f32 1e-12, %v1388_v44 }
0x1194   :  { %v1403_v48 = vmul.f32 %v1721_v46, %v1391_v40  ;;  %vm1409_vm3 = vweird.f32 %v1721_v46 }
0x1195   :  { %1722 = vrsqrt.f32 %v1390_v47  ;;  %vm1410_vm13 = vmor %vm1408_vm12, %vm1409_vm3  ;;  %vm1398_vm15 = vweird.f32 %v1390_v47 }
0x1196   :  { %v1404_v55 = vmul.f32 %v1721_v46, %v1403_v48 }
0x1198   :  { %v1405_v49 = vmul.f32 0.5, %v1404_v55 }
0x119a   :  { %v1406_v56 = vsub.f32 1.5, %v1405_v49 }
0x119b   :  { %v1723_v50 = vpop.eup %1722 }
0x119c   :  { %v1407_v57 = vmul.f32 %v1721_v46, %v1406_v56  ;;  %v1393_v59 = vmul.f32 %v1723_v50, %v1390_v47  ;;  %vm1399_vm14 = vweird.f32 %v1723_v50 }
0x119d   :  { %vm1400_vm0 = vmor %vm1398_vm15, %vm1399_vm14 }
0x119e   :  { %v1411_v60 = vsel %vm1410_vm13, %v1721_v46, %v1407_v57  ;;  %v1394_v61 = vmul.f32 %v1723_v50, %v1393_v59 }
0x119f   :  { %v1413_v31 = vmul.f32 %v1411_v60, %v1379_v42 }
0x11a0   :  { %v1395_v1 = vmul.f32 0.5, %v1394_v61 }
0x11a1   :  { %v1416_v43 = vmul.f32 %v1655_v52, %v1413_v31 }
0x11a2   :  { %v1396_v2 = vsub.f32 1.5, %v1395_v1 }
0x11a3   :  { %v1419_v10 = vadd.f32 %v1656_v62, %v1416_v43 }
0x11a4   :  { %v1397_v17 = vmul.f32 %v1723_v50, %v1396_v2 }
0x11a5   :  { %1441 = vmatpush.msrb.mxu2 %v1419_v10 }
0x11a6   :  { %v1401_v18 = vsel %vm1400_vm0, %v1723_v50, %v1397_v17 }
0x11a7   :  { %v1412_v35 = vmul.f32 %v1401_v18, %v1378_v32 }
0x11a9   :  { %v1415_v4 = vmul.f32 %v1655_v52, %v1412_v35 }
0x11ab   :  { %v1418_v19 = vadd.f32 %v1656_v62, %v1415_v4 }
0x11ad   :  { %1442 = vmatpush.msrb.mxu2 %v1418_v19  ;;  %1616 = vmatmul.msk.f32.vlgmr.msrb.gmra.mxu0 %vm291_vm2, %v1418_v19 }
0x11ae   :  { %1613 = vmatmul.msk.f32.vlgmr.msrb.gmra.mxu2 %vm189_vm10, %v1612_v20 }
0x11af   :  { %1468 = vmatpush.msra.mxu2 %v1450_v27 }
0x11b1   :  { %1469 = vmatpush.msra.mxu2 %v1449_v5 }
0x11b3   :  { %1470 = vmatpush.msra.mxu2 %v1448_v6 }
0x11b5   :  { %1617 = vmatmul.msk.f32.gmra.mxu0 %vm291_vm2, %v1419_v10  ;;  %1471 = vmatpush.msra.mxu2 %v1447_v7 }
0x122a   :  { %v1535_v51 = vpop.f32.mrf.mxu0 }
0x122b   :  { %v1536_v11 = vadd.f32 %v1657_v29, %v1535_v51 }
0x122d   :  { %1542 = vst [vmem:[%s2193_s5] sm:$0xff] %v1536_v11 }
0x1231   :  { %v1444_v12 = vpop.f32.mrf.mxu2 }
0x1232   :  { %v1538_v13 = vpop.f32.mrf.mxu0  ;;  %1614 = vmatmul.msk.f32.vlgmr.msra.gmra.mxu2 %vm291_vm2, %v1444_v12 }
0x1233   :  { %v1539_v14 = vadd.f32 %v1657_v29, %v1538_v13 }
0x1235   :  { %1543 = vst [vmem:[%s2193_s5 + $0x8] sm:$0xff] %v1539_v14 }
0x12b5   :  { %v1473_v21 = vpop.f32.mrf.mxu2 }
0x12b6   :  { %v1474_v22 = vadd.f32 %v1658_v53, %v1473_v21 }
0x12b8   :  { %1724 = vtanh.f32 %v1474_v22 }
0x12be   :  { %v1725_v23 = vpop.eup %1724 }
0x12bf   :  { %1615 = vmatmul.msk.f32.vlgmr.msra.gmra.mxu3 %vm291_vm2, %v1725_v23 }
0x1342   :  { %v1503_v26 = vpop.f32.mrf.mxu3 }
0x1343   :  { %v1504_v0 = vadd.f32 %v1659_v25, %v1503_v26 }
0x1345   :  { %1541 = vst [vmem:[%s2192_s4] sm:$0xff] %v1504_v0 }
0x1346   :  { %1552 = vsyncpa [#allocation3], 1 }

</bundles_post_ra>
